<compile_context>
chip_gen: v7x
topology: tpu7x:2x2x1
jax: 0.10.0
libtpu: 0.0.40
codegen_flags: <defaults>
</compile_context>

<pallas_src>
import functools

import jax
import jax.numpy as jnp
from jax.experimental import pallas as pl
from jax.experimental.pallas import tpu as pltpu

LN_EPS = 1e-5  # PyTorch nn.LayerNorm default


# ------------------------------- fused kernel ------------------------------ #

def _layernorm(z, g, b, eps):
    mean = jnp.mean(z, axis=-1, keepdims=True)
    zc = z - mean
    var = jnp.mean(zc * zc, axis=-1, keepdims=True)
    return zc * jax.lax.rsqrt(var + eps) * g + b


def transformer_kernel(x_ref, wqkv_ref, bqkv_ref, wo_ref, bo_ref,
                       w1_ref, b1_ref, w2_ref, b2_ref,
                       ln1g_ref, ln1b_ref, ln2g_ref, ln2b_ref,
                       o_ref, *, bc, seq, nhead, eps):
    """One grid step == (one batch chunk, one encoder layer).

    o_ref (constant block index along the layer axis) is the VMEM-resident
    activation slab: initialised from x at layer 0, updated every layer, and
    written back to HBM only when the batch chunk changes."""
    layer = pl.program_id(1)

    @pl.when(layer == 0)
    def _():
        o_ref[...] = x_ref[...]

    E = o_ref.shape[-1]
    H = nhead
    D = E // H
    S = seq

    x = o_ref[...]                                               # (bc*S, E) f32

    # ---- packed QKV projection (scale pre-folded into Q), bf16 MXU ----
    qkv = (jnp.dot(x.astype(jnp.bfloat16), wqkv_ref[0],
                   preferred_element_type=jnp.float32)
           + bqkv_ref[0])                                        # (bc*S, 3E)

    # ---- multi-head attention: heads batched into one einsum per matmul ----
    def attend(blk):                                             # blk: (S, 3E)
        qh = jnp.stack([blk[:, h * D:(h + 1) * D] for h in range(H)])
        kh = jnp.stack([blk[:, E + h * D:E + (h + 1) * D] for h in range(H)])
        vh = jnp.stack([blk[:, 2 * E + h * D:2 * E + (h + 1) * D]
                        for h in range(H)])                      # (H, S, D)
        s = jnp.einsum("hqd,hkd->hqk", qh, kh,
                       preferred_element_type=jnp.float32)       # (H, S, S)
        s = s - jnp.max(s, axis=-1, keepdims=True)
        p = jnp.exp(s)
        p = p * pl.reciprocal(jnp.sum(p, axis=-1, keepdims=True), approx=True)
        a = jnp.einsum("hqk,hkd->hqd", p, vh,
                       preferred_element_type=jnp.float32)       # (H, S, D)
        return jnp.concatenate([a[h] for h in range(H)], axis=-1)  # (S, E)

    rows = [attend(qkv[b * S:(b + 1) * S, :]) for b in range(bc)]
    attn = rows[0] if bc == 1 else jnp.concatenate(rows, axis=0)   # (bc*S, E)

    # ---- output projection (bf16 MXU operands, f32 accumulation) ----
    attn = (jnp.dot(attn.astype(jnp.bfloat16), wo_ref[0],
                    preferred_element_type=jnp.float32) + bo_ref[0])

    # ---- residual + LayerNorm 1 (f32) ----
    x1 = _layernorm(x + attn, ln1g_ref[0], ln1b_ref[0], eps)

    # ---- FFN: relu(x1 @ w1 + b1) @ w2 + b2 (bf16 MXU, f32 accumulation) ----
    h1 = (jnp.dot(x1.astype(jnp.bfloat16), w1_ref[0],
                  preferred_element_type=jnp.float32) + b1_ref[0])
    h1 = jnp.maximum(h1, 0.0)
    ff = (jnp.dot(h1.astype(jnp.bfloat16), w2_ref[0],
                  preferred_element_type=jnp.float32) + b2_ref[0])

    # ---- residual + LayerNorm 2 (f32) ----
    o_ref[...] = _layernorm(x1 + ff, ln2g_ref[0], ln2b_ref[0], eps)


# ------------------------------ model forward ------------------------------ #

def transformer_forward(src, shape, params_list, nhead, pos=None,
                        num_row_chunks=None):
    # `shape` is carried for signature fidelity; unused in compute (as in the
    # reference module).  self.norm is None in the reference constructor.
    del shape
    assert pos is None  # TODO(synk): pos path not fused (pos=None config).

    S, B, E = src.shape
    L = len(params_list)
    H = nhead
    D = E // H
    FF = params_list[0]["w1"].shape[1]
    scale = float(D) ** -0.5

    # Batch-chunk ("parallel") grid axis: two chunks feed both v7x TensorCores;
    # on single-TC chips it only re-streams the per-layer weights once more.
    if num_row_chunks is None:
        num_row_chunks = 2 if (B >= 2 and B % 2 == 0) else 1
    assert B % num_row_chunks == 0
    BC = B // num_row_chunks          # batches per grid block
    MB = BC * S                       # activation rows per grid block
    M = B * S

    def stack(name, dtype=jnp.float32):
        return jnp.stack([p[name] for p in params_list]).astype(dtype)

    # Stacked per-layer parameters (leading layer axis, streamed by the grid).
    # Matmul weights in bf16; attention scaling folded into the Q columns.
    wqkv = jnp.stack(
        [jnp.concatenate([p["wq"] * scale, p["wk"], p["wv"]], axis=1)
         for p in params_list]).astype(jnp.bfloat16)               # (L, E, 3E)
    bqkv = jnp.stack(
        [jnp.concatenate([p["bq"] * scale, p["bk"], p["bv"]])[None]
         for p in params_list]).astype(jnp.float32)                # (L, 1, 3E)
    wo = stack("wo", jnp.bfloat16)                                 # (L, E, E)
    bo = stack("bo")[:, None, :]                                   # (L, 1, E)
    w1 = stack("w1", jnp.bfloat16)                                 # (L, E, FF)
    b1 = stack("b1")[:, None, :]                                   # (L, 1, FF)
    w2 = stack("w2", jnp.bfloat16)                                 # (L, FF, E)
    b2 = stack("b2")[:, None, :]                                   # (L, 1, E)
    ln1g = stack("ln1_g")[:, None, :]
    ln1b = stack("ln1_b")[:, None, :]
    ln2g = stack("ln2_g")[:, None, :]
    ln2b = stack("ln2_b")[:, None, :]

    # Batch-major slab: row = b*S + s (each batch is a contiguous (S, E) block).
    x2d = src.transpose(1, 0, 2).reshape(M, E)

    def per_layer(blk):
        return pl.BlockSpec(blk, lambda c, l: (l, 0, 0))

    resident = pl.BlockSpec((MB, E), lambda c, l: (c, 0))

    args = (x2d, wqkv, bqkv, wo, bo, w1, b1, w2, b2,
            ln1g, ln1b, ln2g, ln2b)

    # ---- VMEM audit: double-buffered per-layer weights + resident IO slabs ---
    w_blk = 2 * (E * 3 * E + E * E + E * FF + FF * E)     # bf16 weight blocks
    b_blk = 4 * (3 * E + 6 * E + FF)                      # f32 bias / LN blocks
    io_blk = 2 * MB * E * 4                               # x block + out block
    vmem_need = 2 * (w_blk + b_blk + io_blk) + (4 << 20)
    vmem_limit = int(min(max(vmem_need, 32 << 20), 64 << 20))  # safe on v7x

    flops = L * (2 * M * E * 3 * E                        # packed QKV
                 + 4 * B * H * S * S * D                  # QK^T and PV
                 + 2 * M * E * E                          # out projection
                 + 4 * M * E * FF)                        # FFN
    param_bytes = sum(int(a.size) * a.dtype.itemsize for a in args[1:])
    bytes_accessed = int(param_bytes * num_row_chunks + 2 * M * E * 4)

    out2d = pl.pallas_call(
        functools.partial(transformer_kernel, bc=BC, seq=S, nhead=H,
                          eps=LN_EPS),
        out_shape=jax.ShapeDtypeStruct((M, E), jnp.float32),
        grid=(num_row_chunks, L),
        in_specs=[
            resident,                                             # x
            per_layer((1, E, 3 * E)), per_layer((1, 1, 3 * E)),   # wqkv, bqkv
            per_layer((1, E, E)), per_layer((1, 1, E)),           # wo, bo
            per_layer((1, E, FF)), per_layer((1, 1, FF)),         # w1, b1
            per_layer((1, FF, E)), per_layer((1, 1, E)),          # w2, b2
            per_layer((1, 1, E)), per_layer((1, 1, E)),           # ln1 g, b
            per_layer((1, 1, E)), per_layer((1, 1, E)),           # ln2 g, b
        ],
        out_specs=resident,
        compiler_params=pltpu.CompilerParams(
            dimension_semantics=("parallel", "arbitrary"),
            vmem_limit_bytes=vmem_limit),
        cost_estimate=pl.CostEstimate(
            flops=flops,
            transcendentals=L * B * H * S * S,
            bytes_accessed=bytes_accessed),
    )(*args)

    return out2d.reshape(B, S, E).transpose(1, 0, 2)


# -------------------------------- parameters ------------------------------- #

def init_layer_params(key, E, FF):
    ks = jax.random.split(key, 8)

    def xavier(k, din, dout):
        bnd = (6.0 / (din + dout)) ** 0.5
        return jax.random.uniform(k, (din, dout), jnp.float32, -bnd, bnd)

    def torch_default(k, shape, fan_in):
        bnd = 1.0 / (fan_in ** 0.5)
        return jax.random.uniform(k, shape, jnp.float32, -bnd, bnd)

    # weights stored pre-transposed to (in, out) so kernels do x @ w
    return {
        "wq": xavier(ks[0], E, E), "bq": jnp.zeros((E,), jnp.float32),
        "wk": xavier(ks[1], E, E), "bk": jnp.zeros((E,), jnp.float32),
        "wv": xavier(ks[2], E, E), "bv": jnp.zeros((E,), jnp.float32),
        "wo": xavier(ks[3], E, E), "bo": jnp.zeros((E,), jnp.float32),
        "w1": torch_default(ks[4], (E, FF), E),
        "b1": torch_default(ks[5], (FF,), E),
        "w2": torch_default(ks[6], (FF, E), FF),
        "b2": torch_default(ks[7], (E,), FF),
        "ln1_g": jnp.ones((E,), jnp.float32),
        "ln1_b": jnp.zeros((E,), jnp.float32),
        "ln2_g": jnp.ones((E,), jnp.float32),
        "ln2_b": jnp.zeros((E,), jnp.float32),
    }


# ----------------------------- pure-JAX reference --------------------------- #

def _ref_linear(x, w, b):
    return jnp.dot(x, w, precision=jax.lax.Precision.HIGHEST) + b


def _ref_layer(x, p, pos, H):
    S, B, E = x.shape
    D = E // H
    scale = float(D) ** -0.5
    x2d = x.reshape(S * B, E)
    qk = x2d if pos is None else (x + pos).reshape(S * B, E)
    q = _ref_linear(qk, p["wq"], p["bq"]) * scale
    k = _ref_linear(qk, p["wk"], p["bk"])
    v = _ref_linear(x2d, p["wv"], p["bv"])

    def heads(t):
        return t.reshape(S, B, H, D).transpose(1, 2, 0, 3).reshape(B * H, S, D)

    q, k, v = heads(q), heads(k), heads(v)
    s = jnp.einsum("bqd,bkd->bqk", q, k, precision=jax.lax.Precision.HIGHEST)
    pw = jax.nn.softmax(s, axis=-1)
    a = jnp.einsum("bqk,bkd->bqd", pw, v, precision=jax.lax.Precision.HIGHEST)
    a = a.reshape(B, H, S, D).transpose(2, 0, 1, 3).reshape(S * B, E)
    a = _ref_linear(a, p["wo"], p["bo"])

    def ln(z, g, bb):
        m = jnp.mean(z, -1, keepdims=True)
        zc = z - m
        var = jnp.mean(zc * zc, -1, keepdims=True)
        return zc * jax.lax.rsqrt(var + LN_EPS) * g + bb

    x2d = ln(x2d + a, p["ln1_g"], p["ln1_b"])
    ff = _ref_linear(jnp.maximum(_ref_linear(x2d, p["w1"], p["b1"]), 0.0),
                     p["w2"], p["b2"])
    x2d = ln(x2d + ff, p["ln2_g"], p["ln2_b"])
    return x2d.reshape(S, B, E)


def transformer_ref(src, params_list, H, pos=None):
    out = src
    for p in params_list:
        out = _ref_layer(out, p, pos, H)
    return out


# ----------------------------------- main ----------------------------------- #

if __name__ == "__main__":
    # small shapes consistent with the module: dim (E) = 32 -> nhead=2,
    # head_dim=16; dim_feedforward kept at the module's hardcoded 2048.
    S, B, E = 8, 2, 32          # seq, batch, d_model
    H, FF, LAYERS = 2, 2048, 2

    key = jax.random.PRNGKey(0)
    k_src, k_par = jax.random.split(key)
    src = jax.random.normal(k_src, (S, B, E), jnp.float32)

    layer_keys = jax.random.split(k_par, LAYERS)
    params = [init_layer_params(k, E, FF) for k in layer_keys]

    out = transformer_forward(src, shape=None, params_list=params,
                              nhead=H, pos=None)
    out = jax.block_until_ready(out)

    ref = transformer_ref(src, params, H, pos=None)
    assert out.shape == (S, B, E)
    assert jnp.all(jnp.isfinite(out))
    # bf16 MXU operands (QKV / out-proj / FFN) vs f32-HIGHEST reference.
    err = float(jnp.max(jnp.abs(out - ref)))
    assert jnp.allclose(out, ref, atol=2e-2, rtol=2e-2), err

    print("KERNEL_OK")
</pallas_src>

<mosaic_0001>
module attributes {stable_mosaic.version = 11 : i64} {
  func.func @transformer_kernel(%arg0: i32, %arg1: i32, %arg2: memref<8x32xf32, #tpu.memory_space<vmem>>, %arg3: memref<1x32x96xbf16, #tpu.memory_space<vmem>>, %arg4: memref<1x1x96xf32, #tpu.memory_space<vmem>>, %arg5: memref<1x32x32xbf16, #tpu.memory_space<vmem>>, %arg6: memref<1x1x32xf32, #tpu.memory_space<vmem>>, %arg7: memref<1x32x2048xbf16, #tpu.memory_space<vmem>>, %arg8: memref<1x1x2048xf32, #tpu.memory_space<vmem>>, %arg9: memref<1x2048x32xbf16, #tpu.memory_space<vmem>>, %arg10: memref<1x1x32xf32, #tpu.memory_space<vmem>>, %arg11: memref<1x1x32xf32, #tpu.memory_space<vmem>>, %arg12: memref<1x1x32xf32, #tpu.memory_space<vmem>>, %arg13: memref<1x1x32xf32, #tpu.memory_space<vmem>>, %arg14: memref<1x1x32xf32, #tpu.memory_space<vmem>>, %arg15: memref<8x32xf32, #tpu.memory_space<vmem>>) attributes {dimension_semantics = [#tpu.dimension_semantics<parallel>, #tpu.dimension_semantics<arbitrary>], iteration_bounds = array<i64: 2, 2>, scalar_prefetch = 0 : i64, scratch_operands = 0 : i64, tpu.core_type = #tpu.core_type<tc>, window_params = [{transform_indices = @transform_0, window_bounds = array<i64: 8, 32>}, {transform_indices = @transform_1, window_bounds = array<i64: 1, 32, 96>}, {transform_indices = @transform_2, window_bounds = array<i64: 1, 1, 96>}, {transform_indices = @transform_3, window_bounds = array<i64: 1, 32, 32>}, {transform_indices = @transform_4, window_bounds = array<i64: 1, 1, 32>}, {transform_indices = @transform_5, window_bounds = array<i64: 1, 32, 2048>}, {transform_indices = @transform_6, window_bounds = array<i64: 1, 1, 2048>}, {transform_indices = @transform_7, window_bounds = array<i64: 1, 2048, 32>}, {transform_indices = @transform_8, window_bounds = array<i64: 1, 1, 32>}, {transform_indices = @transform_9, window_bounds = array<i64: 1, 1, 32>}, {transform_indices = @transform_10, window_bounds = array<i64: 1, 1, 32>}, {transform_indices = @transform_11, window_bounds = array<i64: 1, 1, 32>}, {transform_indices = @transform_12, window_bounds = array<i64: 1, 1, 32>}, {transform_indices = @transform_13, window_bounds = array<i64: 8, 32>}]} {
    %c0_i32 = arith.constant 0 : i32
    %0 = arith.cmpi eq, %arg1, %c0_i32 : i32
    %1 = arith.extui %0 : i1 to i32
    %c0_i32_0 = arith.constant 0 : i32
    %2 = arith.cmpi ne, %1, %c0_i32_0 : i32
    scf.if %2 {
      %c0_58 = arith.constant 0 : index
      %c0_59 = arith.constant 0 : index
      %121 = vector.load %arg2[%c0_58, %c0_59] : memref<8x32xf32, #tpu.memory_space<vmem>>, vector<8x32xf32>
      %c0_60 = arith.constant 0 : index
      %c0_61 = arith.constant 0 : index
      %122 = vector.load %arg15[%c0_60, %c0_61] : memref<8x32xf32, #tpu.memory_space<vmem>>, vector<8x32xf32>
      tpu.vector_store %arg15[%c0_60, %c0_61], %121 {strides = array<i32>} : memref<8x32xf32, #tpu.memory_space<vmem>>, vector<8x32xf32>,
    } else {
    }
    %c0 = arith.constant 0 : index
    %c0_1 = arith.constant 0 : index
    %3 = vector.load %arg15[%c0, %c0_1] : memref<8x32xf32, #tpu.memory_space<vmem>>, vector<8x32xf32>
    %4 = arith.truncf %3 : vector<8x32xf32> to vector<8x32xbf16>
    %c0_2 = arith.constant 0 : index
    %c0_3 = arith.constant 0 : index
    %c0_4 = arith.constant 0 : index
    %5 = vector.load %arg3[%c0_2, %c0_3, %c0_4] : memref<1x32x96xbf16, #tpu.memory_space<vmem>>, vector<1x32x96xbf16>
    %6 = vector.shape_cast %5 : vector<1x32x96xbf16> to vector<32x96xbf16>
    %cst = arith.constant dense<0.000000e+00> : vector<8x96xf32>
    %7 = tpu.matmul %4, %6, %cst {dimension_numbers = #tpu.dot_dimension_numbers<[1], [0], [0], [1], [0, 0, 1, 1], [], []>} : vector<8x32xbf16>, vector<32x96xbf16>, vector<8x96xf32> -> vector<8x96xf32>
    %c0_5 = arith.constant 0 : index
    %c0_6 = arith.constant 0 : index
    %c0_7 = arith.constant 0 : index
    %8 = vector.load %arg4[%c0_5, %c0_6, %c0_7] : memref<1x1x96xf32, #tpu.memory_space<vmem>>, vector<1x1x96xf32>
    %9 = vector.shape_cast %8 : vector<1x1x96xf32> to vector<1x96xf32>
    %10 = vector.broadcast %9 : vector<1x96xf32> to vector<8x96xf32>
    %11 = arith.addf %7, %10 : vector<8x96xf32>
    %12 = vector.extract_strided_slice %11 {offsets = [0, 0], sizes = [8, 16], strides = [1, 1]} : vector<8x96xf32> to vector<8x16xf32>
    %13 = vector.extract_strided_slice %11 {offsets = [0, 16], sizes = [8, 16], strides = [1, 1]} : vector<8x96xf32> to vector<8x16xf32>
    %14 = vector.shape_cast %12 : vector<8x16xf32> to vector<1x8x16xf32>
    %15 = vector.shape_cast %13 : vector<8x16xf32> to vector<1x8x16xf32>
    %16 = tpu.concatenate %14, %15 in 0 : vector<1x8x16xf32>, vector<1x8x16xf32> -> vector<2x8x16xf32>
    %17 = vector.extract_strided_slice %11 {offsets = [0, 32], sizes = [8, 16], strides = [1, 1]} : vector<8x96xf32> to vector<8x16xf32>
    %18 = vector.extract_strided_slice %11 {offsets = [0, 48], sizes = [8, 16], strides = [1, 1]} : vector<8x96xf32> to vector<8x16xf32>
    %19 = vector.shape_cast %17 : vector<8x16xf32> to vector<1x8x16xf32>
    %20 = vector.shape_cast %18 : vector<8x16xf32> to vector<1x8x16xf32>
    %21 = tpu.concatenate %19, %20 in 0 : vector<1x8x16xf32>, vector<1x8x16xf32> -> vector<2x8x16xf32>
    %22 = vector.extract_strided_slice %11 {offsets = [0, 64], sizes = [8, 16], strides = [1, 1]} : vector<8x96xf32> to vector<8x16xf32>
    %23 = vector.extract_strided_slice %11 {offsets = [0, 80], sizes = [8, 16], strides = [1, 1]} : vector<8x96xf32> to vector<8x16xf32>
    %24 = vector.shape_cast %22 : vector<8x16xf32> to vector<1x8x16xf32>
    %25 = vector.shape_cast %23 : vector<8x16xf32> to vector<1x8x16xf32>
    %26 = tpu.concatenate %24, %25 in 0 : vector<1x8x16xf32>, vector<1x8x16xf32> -> vector<2x8x16xf32>
    "tpu.trace_start"() <{level = 10 : i32, message = "hqd,hkd->hqk"}> : () -> ()
    %cst_8 = arith.constant dense<0.000000e+00> : vector<2x8x8xf32>
    %27 = tpu.matmul %16, %21, %cst_8 {dimension_numbers = #tpu.dot_dimension_numbers<[2], [2], [1], [1], [0, 0, 0, 1, 1, 1], [0], [0]>} : vector<2x8x16xf32>, vector<2x8x16xf32>, vector<2x8x8xf32> -> vector<2x8x8xf32>
    "tpu.trace_stop"() : () -> ()
    %cst_9 = arith.constant dense<0xFF800000> : vector<2x8xf32>
    %28 = vector.multi_reduction <maximumf>, %27, %cst_9 [2] : vector<2x8x8xf32> to vector<2x8xf32>
    %29 = vector.shape_cast %28 : vector<2x8xf32> to vector<2x8x1xf32>
    %30 = vector.broadcast %29 : vector<2x8x1xf32> to vector<2x8x8xf32>
    %31 = arith.subf %27, %30 : vector<2x8x8xf32>
    %32 = math.exp %31 : vector<2x8x8xf32>
    %cst_10 = arith.constant dense<0.000000e+00> : vector<2x8xf32>
    %33 = vector.multi_reduction <add>, %32, %cst_10 [2] : vector<2x8x8xf32> to vector<2x8xf32>
    %34 = vector.shape_cast %33 : vector<2x8xf32> to vector<2x8x1xf32>
    %35 = tpu.reciprocal %34 {approx = true} : vector<2x8x1xf32> -> vector<2x8x1xf32>
    %36 = vector.broadcast %35 : vector<2x8x1xf32> to vector<2x8x8xf32>
    %37 = arith.mulf %32, %36 : vector<2x8x8xf32>
    "tpu.trace_start"() <{level = 10 : i32, message = "hqk,hkd->hqd"}> : () -> ()
    %cst_11 = arith.constant dense<0.000000e+00> : vector<2x8x16xf32>
    %38 = tpu.matmul %37, %26, %cst_11 {dimension_numbers = #tpu.dot_dimension_numbers<[2], [1], [1], [2], [0, 0, 0, 1, 1, 2], [0], [0]>} : vector<2x8x8xf32>, vector<2x8x16xf32>, vector<2x8x16xf32> -> vector<2x8x16xf32>
    "tpu.trace_stop"() : () -> ()
    %39 = vector.extract_strided_slice %38 {offsets = [0, 0, 0], sizes = [1, 8, 16], strides = [1, 1, 1]} : vector<2x8x16xf32> to vector<1x8x16xf32>
    %40 = vector.shape_cast %39 : vector<1x8x16xf32> to vector<8x16xf32>
    %41 = vector.extract_strided_slice %38 {offsets = [1, 0, 0], sizes = [1, 8, 16], strides = [1, 1, 1]} : vector<2x8x16xf32> to vector<1x8x16xf32>
    %42 = vector.shape_cast %41 : vector<1x8x16xf32> to vector<8x16xf32>
    %43 = tpu.concatenate %40, %42 in 1 : vector<8x16xf32>, vector<8x16xf32> -> vector<8x32xf32>
    %44 = arith.truncf %43 : vector<8x32xf32> to vector<8x32xbf16>
    %c0_12 = arith.constant 0 : index
    %c0_13 = arith.constant 0 : index
    %c0_14 = arith.constant 0 : index
    %45 = vector.load %arg5[%c0_12, %c0_13, %c0_14] : memref<1x32x32xbf16, #tpu.memory_space<vmem>>, vector<1x32x32xbf16>
    %46 = vector.shape_cast %45 : vector<1x32x32xbf16> to vector<32x32xbf16>
    %cst_15 = arith.constant dense<0.000000e+00> : vector<8x32xf32>
    %47 = tpu.matmul %44, %46, %cst_15 {dimension_numbers = #tpu.dot_dimension_numbers<[1], [0], [0], [1], [0, 0, 1, 1], [], []>} : vector<8x32xbf16>, vector<32x32xbf16>, vector<8x32xf32> -> vector<8x32xf32>
    %c0_16 = arith.constant 0 : index
    %c0_17 = arith.constant 0 : index
    %c0_18 = arith.constant 0 : index
    %48 = vector.load %arg6[%c0_16, %c0_17, %c0_18] : memref<1x1x32xf32, #tpu.memory_space<vmem>>, vector<1x1x32xf32>
    %49 = vector.shape_cast %48 : vector<1x1x32xf32> to vector<1x32xf32>
    %50 = vector.broadcast %49 : vector<1x32xf32> to vector<8x32xf32>
    %51 = arith.addf %47, %50 : vector<8x32xf32>
    %52 = arith.addf %3, %51 : vector<8x32xf32>
    %c0_19 = arith.constant 0 : index
    %c0_20 = arith.constant 0 : index
    %c0_21 = arith.constant 0 : index
    %53 = vector.load %arg11[%c0_19, %c0_20, %c0_21] : memref<1x1x32xf32, #tpu.memory_space<vmem>>, vector<1x1x32xf32>
    %54 = vector.shape_cast %53 : vector<1x1x32xf32> to vector<1x32xf32>
    %c0_22 = arith.constant 0 : index
    %c0_23 = arith.constant 0 : index
    %c0_24 = arith.constant 0 : index
    %55 = vector.load %arg12[%c0_22, %c0_23, %c0_24] : memref<1x1x32xf32, #tpu.memory_space<vmem>>, vector<1x1x32xf32>
    %56 = vector.shape_cast %55 : vector<1x1x32xf32> to vector<1x32xf32>
    %cst_25 = arith.constant dense<0.000000e+00> : vector<8xf32>
    %57 = vector.multi_reduction <add>, %52, %cst_25 [1] : vector<8x32xf32> to vector<8xf32>
    %58 = vector.shape_cast %57 : vector<8xf32> to vector<8x1xf32>
    %cst_26 = arith.constant 3.200000e+01 : f32
    %59 = vector.broadcast %cst_26 : f32 to vector<8x1xf32>
    %60 = arith.divf %58, %59 : vector<8x1xf32>
    %61 = vector.broadcast %60 : vector<8x1xf32> to vector<8x32xf32>
    %62 = arith.subf %52, %61 : vector<8x32xf32>
    %63 = arith.mulf %62, %62 : vector<8x32xf32>
    %cst_27 = arith.constant dense<0.000000e+00> : vector<8xf32>
    %64 = vector.multi_reduction <add>, %63, %cst_27 [1] : vector<8x32xf32> to vector<8xf32>
    %65 = vector.shape_cast %64 : vector<8xf32> to vector<8x1xf32>
    %cst_28 = arith.constant 3.200000e+01 : f32
    %66 = vector.broadcast %cst_28 : f32 to vector<8x1xf32>
    %67 = arith.divf %65, %66 : vector<8x1xf32>
    %cst_29 = arith.constant 9.99999974E-6 : f32
    %68 = vector.broadcast %cst_29 : f32 to vector<8x1xf32>
    %69 = arith.addf %67, %68 : vector<8x1xf32>
    %70 = math.rsqrt %69 : vector<8x1xf32>
    %71 = vector.broadcast %70 : vector<8x1xf32> to vector<8x32xf32>
    %72 = arith.mulf %62, %71 : vector<8x32xf32>
    %73 = vector.broadcast %54 : vector<1x32xf32> to vector<8x32xf32>
    %74 = arith.mulf %72, %73 : vector<8x32xf32>
    %75 = vector.broadcast %56 : vector<1x32xf32> to vector<8x32xf32>
    %76 = arith.addf %74, %75 : vector<8x32xf32>
    %77 = arith.truncf %76 : vector<8x32xf32> to vector<8x32xbf16>
    %c0_30 = arith.constant 0 : index
    %c0_31 = arith.constant 0 : index
    %c0_32 = arith.constant 0 : index
    %78 = vector.load %arg7[%c0_30, %c0_31, %c0_32] : memref<1x32x2048xbf16, #tpu.memory_space<vmem>>, vector<1x32x2048xbf16>
    %79 = vector.shape_cast %78 : vector<1x32x2048xbf16> to vector<32x2048xbf16>
    %cst_33 = arith.constant dense<0.000000e+00> : vector<8x2048xf32>
    %80 = tpu.matmul %77, %79, %cst_33 {dimension_numbers = #tpu.dot_dimension_numbers<[1], [0], [0], [1], [0, 0, 1, 1], [], []>} : vector<8x32xbf16>, vector<32x2048xbf16>, vector<8x2048xf32> -> vector<8x2048xf32>
    %c0_34 = arith.constant 0 : index
    %c0_35 = arith.constant 0 : index
    %c0_36 = arith.constant 0 : index
    %81 = vector.load %arg8[%c0_34, %c0_35, %c0_36] : memref<1x1x2048xf32, #tpu.memory_space<vmem>>, vector<1x1x2048xf32>
    %82 = vector.shape_cast %81 : vector<1x1x2048xf32> to vector<1x2048xf32>
    %83 = vector.broadcast %82 : vector<1x2048xf32> to vector<8x2048xf32>
    %84 = arith.addf %80, %83 : vector<8x2048xf32>
    %cst_37 = arith.constant 0.000000e+00 : f32
    %85 = vector.broadcast %cst_37 : f32 to vector<8x2048xf32>
    %86 = arith.maximumf %84, %85 : vector<8x2048xf32>
    %87 = arith.truncf %86 : vector<8x2048xf32> to vector<8x2048xbf16>
    %c0_38 = arith.constant 0 : index
    %c0_39 = arith.constant 0 : index
    %c0_40 = arith.constant 0 : index
    %88 = vector.load %arg9[%c0_38, %c0_39, %c0_40] : memref<1x2048x32xbf16, #tpu.memory_space<vmem>>, vector<1x2048x32xbf16>
    %89 = vector.shape_cast %88 : vector<1x2048x32xbf16> to vector<2048x32xbf16>
    %cst_41 = arith.constant dense<0.000000e+00> : vector<8x32xf32>
    %90 = tpu.matmul %87, %89, %cst_41 {dimension_numbers = #tpu.dot_dimension_numbers<[1], [0], [0], [1], [0, 0, 1, 1], [], []>} : vector<8x2048xbf16>, vector<2048x32xbf16>, vector<8x32xf32> -> vector<8x32xf32>
    %c0_42 = arith.constant 0 : index
    %c0_43 = arith.constant 0 : index
    %c0_44 = arith.constant 0 : index
    %91 = vector.load %arg10[%c0_42, %c0_43, %c0_44] : memref<1x1x32xf32, #tpu.memory_space<vmem>>, vector<1x1x32xf32>
    %92 = vector.shape_cast %91 : vector<1x1x32xf32> to vector<1x32xf32>
    %93 = vector.broadcast %92 : vector<1x32xf32> to vector<8x32xf32>
    %94 = arith.addf %90, %93 : vector<8x32xf32>
    %95 = arith.addf %76, %94 : vector<8x32xf32>
    %c0_45 = arith.constant 0 : index
    %c0_46 = arith.constant 0 : index
    %c0_47 = arith.constant 0 : index
    %96 = vector.load %arg13[%c0_45, %c0_46, %c0_47] : memref<1x1x32xf32, #tpu.memory_space<vmem>>, vector<1x1x32xf32>
    %97 = vector.shape_cast %96 : vector<1x1x32xf32> to vector<1x32xf32>
    %c0_48 = arith.constant 0 : index
    %c0_49 = arith.constant 0 : index
    %c0_50 = arith.constant 0 : index
    %98 = vector.load %arg14[%c0_48, %c0_49, %c0_50] : memref<1x1x32xf32, #tpu.memory_space<vmem>>, vector<1x1x32xf32>
    %99 = vector.shape_cast %98 : vector<1x1x32xf32> to vector<1x32xf32>
    %cst_51 = arith.constant dense<0.000000e+00> : vector<8xf32>
    %100 = vector.multi_reduction <add>, %95, %cst_51 [1] : vector<8x32xf32> to vector<8xf32>
    %101 = vector.shape_cast %100 : vector<8xf32> to vector<8x1xf32>
    %cst_52 = arith.constant 3.200000e+01 : f32
    %102 = vector.broadcast %cst_52 : f32 to vector<8x1xf32>
    %103 = arith.divf %101, %102 : vector<8x1xf32>
    %104 = vector.broadcast %103 : vector<8x1xf32> to vector<8x32xf32>
    %105 = arith.subf %95, %104 : vector<8x32xf32>
    %106 = arith.mulf %105, %105 : vector<8x32xf32>
    %cst_53 = arith.constant dense<0.000000e+00> : vector<8xf32>
    %107 = vector.multi_reduction <add>, %106, %cst_53 [1] : vector<8x32xf32> to vector<8xf32>
    %108 = vector.shape_cast %107 : vector<8xf32> to vector<8x1xf32>
    %cst_54 = arith.constant 3.200000e+01 : f32
    %109 = vector.broadcast %cst_54 : f32 to vector<8x1xf32>
    %110 = arith.divf %108, %109 : vector<8x1xf32>
    %cst_55 = arith.constant 9.99999974E-6 : f32
    %111 = vector.broadcast %cst_55 : f32 to vector<8x1xf32>
    %112 = arith.addf %110, %111 : vector<8x1xf32>
    %113 = math.rsqrt %112 : vector<8x1xf32>
    %114 = vector.broadcast %113 : vector<8x1xf32> to vector<8x32xf32>
    %115 = arith.mulf %105, %114 : vector<8x32xf32>
    %116 = vector.broadcast %97 : vector<1x32xf32> to vector<8x32xf32>
    %117 = arith.mulf %115, %116 : vector<8x32xf32>
    %118 = vector.broadcast %99 : vector<1x32xf32> to vector<8x32xf32>
    %119 = arith.addf %117, %118 : vector<8x32xf32>
    %c0_56 = arith.constant 0 : index
    %c0_57 = arith.constant 0 : index
    %120 = vector.load %arg15[%c0_56, %c0_57] : memref<8x32xf32, #tpu.memory_space<vmem>>, vector<8x32xf32>
    tpu.vector_store %arg15[%c0_56, %c0_57], %119 {strides = array<i32>} : memref<8x32xf32, #tpu.memory_space<vmem>>, vector<8x32xf32>,
    return
  }
  func.func @transform_0(%arg0: i32, %arg1: i32) -> (i32, i32) {
    %c0_i32 = arith.constant 0 : i32
    %c0_i32_0 = arith.constant 0 : i32
    return %arg0, %c0_i32 : i32, i32
  }
  func.func @transform_1(%arg0: i32, %arg1: i32) -> (i32, i32, i32) {
    %c0_i32 = arith.constant 0 : i32
    %c0_i32_0 = arith.constant 0 : i32
    %c0_i32_1 = arith.constant 0 : i32
    return %arg1, %c0_i32, %c0_i32_0 : i32, i32, i32
  }
  func.func @transform_2(%arg0: i32, %arg1: i32) -> (i32, i32, i32) {
    %c0_i32 = arith.constant 0 : i32
    %c0_i32_0 = arith.constant 0 : i32
    %c0_i32_1 = arith.constant 0 : i32
    return %arg1, %c0_i32, %c0_i32_0 : i32, i32, i32
  }
  func.func @transform_3(%arg0: i32, %arg1: i32) -> (i32, i32, i32) {
    %c0_i32 = arith.constant 0 : i32
    %c0_i32_0 = arith.constant 0 : i32
    %c0_i32_1 = arith.constant 0 : i32
    return %arg1, %c0_i32, %c0_i32_0 : i32, i32, i32
  }
  func.func @transform_4(%arg0: i32, %arg1: i32) -> (i32, i32, i32) {
    %c0_i32 = arith.constant 0 : i32
    %c0_i32_0 = arith.constant 0 : i32
    %c0_i32_1 = arith.constant 0 : i32
    return %arg1, %c0_i32, %c0_i32_0 : i32, i32, i32
  }
  func.func @transform_5(%arg0: i32, %arg1: i32) -> (i32, i32, i32) {
    %c0_i32 = arith.constant 0 : i32
    %c0_i32_0 = arith.constant 0 : i32
    %c0_i32_1 = arith.constant 0 : i32
    return %arg1, %c0_i32, %c0_i32_0 : i32, i32, i32
  }
  func.func @transform_6(%arg0: i32, %arg1: i32) -> (i32, i32, i32) {
    %c0_i32 = arith.constant 0 : i32
    %c0_i32_0 = arith.constant 0 : i32
    %c0_i32_1 = arith.constant 0 : i32
    return %arg1, %c0_i32, %c0_i32_0 : i32, i32, i32
  }
  func.func @transform_7(%arg0: i32, %arg1: i32) -> (i32, i32, i32) {
    %c0_i32 = arith.constant 0 : i32
    %c0_i32_0 = arith.constant 0 : i32
    %c0_i32_1 = arith.constant 0 : i32
    return %arg1, %c0_i32, %c0_i32_0 : i32, i32, i32
  }
  func.func @transform_8(%arg0: i32, %arg1: i32) -> (i32, i32, i32) {
    %c0_i32 = arith.constant 0 : i32
    %c0_i32_0 = arith.constant 0 : i32
    %c0_i32_1 = arith.constant 0 : i32
    return %arg1, %c0_i32, %c0_i32_0 : i32, i32, i32
  }
  func.func @transform_9(%arg0: i32, %arg1: i32) -> (i32, i32, i32) {
    %c0_i32 = arith.constant 0 : i32
    %c0_i32_0 = arith.constant 0 : i32
    %c0_i32_1 = arith.constant 0 : i32
    return %arg1, %c0_i32, %c0_i32_0 : i32, i32, i32
  }
  func.func @transform_10(%arg0: i32, %arg1: i32) -> (i32, i32, i32) {
    %c0_i32 = arith.constant 0 : i32
    %c0_i32_0 = arith.constant 0 : i32
    %c0_i32_1 = arith.constant 0 : i32
    return %arg1, %c0_i32, %c0_i32_0 : i32, i32, i32
  }
  func.func @transform_11(%arg0: i32, %arg1: i32) -> (i32, i32, i32) {
    %c0_i32 = arith.constant 0 : i32
    %c0_i32_0 = arith.constant 0 : i32
    %c0_i32_1 = arith.constant 0 : i32
    return %arg1, %c0_i32, %c0_i32_0 : i32, i32, i32
  }
  func.func @transform_12(%arg0: i32, %arg1: i32) -> (i32, i32, i32) {
    %c0_i32 = arith.constant 0 : i32
    %c0_i32_0 = arith.constant 0 : i32
    %c0_i32_1 = arith.constant 0 : i32
    return %arg1, %c0_i32, %c0_i32_0 : i32, i32, i32
  }
  func.func @transform_13(%arg0: i32, %arg1: i32) -> (i32, i32) {
    %c0_i32 = arith.constant 0 : i32
    %c0_i32_0 = arith.constant 0 : i32
    return %arg0, %c0_i32 : i32, i32
  }
}

</mosaic_0001>

<bundles_post_ra>
// kernel: tpu_custom_call.1
= control target key start
LH: loop header
LB: loop body
LE: loop exit
PB: predicated region body
PF: predicated region fallthrough
CT: control target
= control target key end

     0   :  { %s4768_s0 = inlined_call_operand.vmem [shape: f32[16,32], index: 0, kind: input, shape index: {}]   ;;  %s4769_s1 = inlined_call_operand.vmem [shape: bf16[2,32,96], index: 1, kind: input, shape index: {}]   ;;  %s4770_s2 = inlined_call_operand.vmem [shape: f32[2,1,96], index: 2, kind: input, shape index: {}]   ;;  %s4771_s3 = inlined_call_operand.vmem [shape: bf16[2,32,32], index: 3, kind: input, shape index: {}]   ;;  %s4772_s4 = inlined_call_operand.vmem [shape: f32[2,1,32], index: 4, kind: input, shape index: {}]   ;;  %s4773_s5 = inlined_call_operand.vmem [shape: bf16[2,32,2048], index: 5, kind: input, shape index: {}]   ;;  %s4774_s6 = inlined_call_operand.vmem [shape: f32[2,1,2048], index: 6, kind: input, shape index: {}]   ;;  %s4775_s7 = inlined_call_operand.vmem [shape: bf16[2,2048,32], index: 7, kind: input, shape index: {}]   ;;  %s4776_s8 = inlined_call_operand.vmem [shape: f32[2,1,32], index: 8, kind: input, shape index: {}]   ;;  %s4777_s9 = inlined_call_operand.vmem [shape: f32[2,1,32], index: 9, kind: input, shape index: {}]   ;;  %s4778_s10 = inlined_call_operand.vmem [shape: f32[2,1,32], index: 10, kind: input, shape index: {}]   ;;  %s4779_s11 = inlined_call_operand.vmem [shape: f32[2,1,32], index: 11, kind: input, shape index: {}]   ;;  %s4780_s12 = inlined_call_operand.vmem [shape: f32[2,1,32], index: 12, kind: input, shape index: {}]   ;;  %s4781_s13 = inlined_call_operand.hbm [shape: f32[16,32], index: 13, kind: output, shape index: {}]  }
   0x1   :  { %4797 = sst [smem:[#allocation18_spill]] %s4768_s0 }
   0x2   :  { %4798 = sst [smem:[#allocation19_spill]] %s4769_s1 }
   0x3   :  { %4799 = sst [smem:[#allocation20_spill]] %s4771_s3 }
   0x4   :  { %4800 = sst [smem:[#allocation21_spill]] %s4773_s5 }
   0x5   :  { %4801 = sst [smem:[#allocation22_spill]] %s4774_s6 }
   0x6   :  { %4802 = sst [smem:[#allocation23_spill]] %s4775_s7 }
   0x7   :  { %4803 = sst [smem:[#allocation24_spill]] %s4780_s12 }
   0x8   :  { %4804 = sst [smem:[#allocation25_spill]] %s4781_s13 }
   0x9   :  { %18 = vsyncpa [#allocation3], 0 }
   0xa   :  { %20 = vsyncpa [#allocation3 + $0x1], 0  ;;  %s4217_s25 = smov 0   ;;  %s4219_s26 = smov 0  }
   0xb   :  { %s4221_s27 = smov 0   ;;  %s4223_s28 = smov 0  }
   0xc   :  { %s4225_s29 = smov 0   ;;  %s4227_s30 = smov 0  }
   0xd   :  { %s4229_s14 = smov 0   ;;  %s4231_s15 = smov 0  }
   0xe LB: > { %4805 = sst [smem:[#allocation5_spill]] %s4109_s25  ;;  %s3383_s16 = sadd.s32 4294967295, %s4137_s15   ;;  %s4137_s15 = sphi %s4231_s15, %s26_s15   ;;  %s4133_s14 = sphi %s4229_s14, %s4845_s14   ;;  %s4129_s30 = sphi %s4227_s30, %s4844_s30   ;;  %s4125_s29 = sphi %s4225_s29, %s4843_s29   ;;  %s4121_s28 = sphi %s4223_s28, %s4842_s28   ;;  %s4117_s27 = sphi %s4221_s27, %s4841_s27   ;;  %s4113_s26 = sphi %s4219_s26, %s4840_s26   ;;  %s4109_s25 = sphi %s4217_s25, %s4839_s25  }
   0xf   : > { %4806 = sst [smem:[#allocation6_spill]] %s4113_s26  ;;  %s3384_s17 = sadd.s32 4294967294, %s4137_s15  }
  0x10   : > { %4807 = sst [smem:[#allocation7_spill]] %s4117_s27  ;;  %s35_s18 = sadd.s32 1, %s4129_s30 }
  0x11   : > { %4808 = sst [smem:[#allocation8_spill]] %s4121_s28  ;;  %p36_p0 = scmp.ge.s32.totalorder %s35_s18, 2 }
  0x12   : > { %4809 = sst [smem:[#allocation9_spill]] %s4125_s29  ;;  %s38_s19 = sadd.s32 1, %s4133_s14 }
  0x13   : > { %4810 = sst [smem:[#allocation10_spill]] %s4129_s30  ;;  %p393_p1 = scmp.ne.s32.totalorder %s4117_s27, %s4113_s26 }
  0x14   : > { %4811 = sst [smem:[#allocation11_spill]] %s4133_s14  ;;  %p394_p2 = scmp.eq.s32.totalorder %s3383_s16, 3 }
  0x15   : > { %4812 = sst [smem:[#allocation12_spill]] %s4137_s15  ;;  %s4847_s18 = smov (%p36_p0, %s35_s18), 0 }
  0x16   : > { %4813 = sst [smem:[#allocation13_spill]] %s4847_s18  ;;  %s4849_s19 = smov (!%p36_p0, %s38_s19), %s4133_s14 }
  0x17   : > { %p4266_p3 = por %p394_p2, %p393_p1  ;;  %p399_p4 = scmp.ne.s32.totalorder %s4113_s26, %s4109_s25 }
  0x18   : > { %p40_p5 = scmp.ge.s32.totalorder %s4849_s19, 2  ;;  %p400_p6 = scmp.eq.s32.totalorder %s3384_s17, 3 }
  0x19   : > { %s4814_s20 = scalar_select %p4266_p3, 1, 0 }
  0x1a   : > { %p3387_p7 = scmp.ge.s32.totalorder %s4137_s15, 1  ;;  %p506_p8 = scmp.lt.s32.totalorder %s4137_s15, 5 }
  0x1b   : > { %4815 = sst [smem:[#allocation14_spill]] %s4814_s20  ;;  %s4851_s19 = smov (%p40_p5, %s4849_s19), 0 }
  0x1c   : > { %4816 = sst [smem:[#allocation15_spill]] %s4851_s19  ;;  %p4276_p9 = por %p400_p6, %p399_p4 }
  0x1d   : > { %p507_p10 = pnand %p3387_p7, %p506_p8  ;;  %s380_s22 = ssub.s32 %s4133_s14, %s4851_s19 }
  0x1e   : > { %s4817_s21 = scalar_select %p4276_p9, 1, 0 }
  0x1f   : > { %s383_s23 = sadd.s32 1, %s4117_s27  ;;  %p381_p11 = scmp.eq.s32.totalorder %s380_s22, 0 }
  0x20   : > { %4818 = sst [smem:[#allocation16_spill]] %s4817_s21  ;;  %510 = sbr.rel (%p507_p10) target bundleno = 2771 (0xad3), region = 72 }
  0x21   : > { %s4284_s24 = scalar_select %p381_p11, %s4117_s27, %s383_s23  }
  0x22   : > { %s4785_s16 = sand.u32 (!%p507_p10), 1, %s4113_s26   ;;  %p594_p12 = scmp.lt.s32.totalorder (!%p507_p10), %s4125_s29, 1 }
  0x23   : > { %4819 = sst [smem:[#allocation17_spill]] %s4284_s24  ;;  %s3388_s17 = sshll.u32 (!%p507_p10), %s4785_s16, 3 }
  0x24   : > { %p598_p13 = scmp.lt.s32.totalorder (!%p507_p10), %s4121_s28, 1  ;;  %s4820_s0 = sld [smem:[#allocation18_spill]] (!%p507_p10) }
  0x25   : > { %s4821_s1 = sld [smem:[#allocation19_spill]] (!%p507_p10)  ;;  %s4822_s3 = sld [smem:[#allocation20_spill]] (!%p507_p10) }
  0x26   : > { %s4823_s6 = sld [smem:[#allocation22_spill]] (!%p507_p10)  ;;  %s4824_s5 = sld [smem:[#allocation21_spill]] (!%p507_p10) }
  0x27   : > { %s595_s18 = scalar_select %p594_p12, %s4125_s29, 1 }
  0x28   : > { %s4293_s30 = scalar_select %p598_p13, %s4121_s28, 1 }
  0x29   : > { %s3389_s22 = sshll.u32 %s595_s18, 3  ;;  %s4825_s7 = sld [smem:[#allocation23_spill]] }
  0x2a   : > { %s597_s14 = scalar_lea.vmem %s4820_s0, %s3389_s22  ;;  %s3591_s16 = sshll.u32 %s4293_s30, 4 }
  0x2b   : > { %s602_s21 = scalar_lea.vmem %s4821_s1, %s3591_s16  ;;  %s4309_s29 = scalar_lea.vmem %s4822_s3, %s3591_s16 }
  0x2c   : > { %s3593_s23 = sshll.u32 %s4293_s30, 8  ;;  %s4319_s12 = scalar_lea.vmem %s4823_s6, %s3591_s16 }
  0x2d   : > { %s4324_s25 = scalar_lea.vmem %s4824_s5, %s3593_s23  ;;  %s3594_s15 = sshll.u32 %s4293_s30, 10 }
  0x2e   : > { %s630_s18 = scalar_lea.vmem %s4776_s8, %s4293_s30  ;;  %s633_s0 = scalar_lea.vmem %s4777_s9, %s4293_s30 }
  0x2f   : > { %s4330_s20 = scalar_lea.vmem %s4825_s7, %s3594_s15  ;;  %s636_s27 = scalar_lea.vmem %s4778_s10, %s4293_s30 }
  0x30   : > { %s639_s5 = scalar_lea.vmem %s4779_s11, %s4293_s30  ;;  %s4826_s15 = sld [smem:[#allocation24_spill]] }
  0x31   : > { %s4352_s7 = scalar_lea.vmem [#allocation2], %s3388_s17  ;;  %s4827_s1 = sld [smem:[#allocation8_spill]] }
  0x36   : > { %s642_s26 = scalar_lea.vmem %s4826_s15, %s4293_s30 }
  0x37   : > { %p3399_p0 = scmp.ne.s32.totalorder %s4827_s1, 0 }
  0x38   : > { %v648_v0 = vld [vmem:[%s597_s14] sm:$0xff] (!%p3399_p0)  ;;  %vm649_vm0 = vcmask (!%p3399_p0), 261120  }
  0x39   : > { %647 = sbr.rel (%p3399_p0) target bundleno = 64 (0x40), region = 76  ;;  %650 = vst.msk [vmem:[%s4352_s7] sm:$0xff] (!%p3399_p0), %vm649_vm0, %v648_v0 }
  0x40 PF: > { %v3899_v1 = vld [vmem:[%s602_s21] sm:$0xff]   ;;  %v4139_v2 = vmov 0.0   ;;  %v3900_v3 = vld [vmem:[%s602_s21 + $0x8] sm:$0xff]   ;;  %vm4140_vm1 = vmmov 0   ;;  %vm676_vm2 = vcmask 261120   ;;  %s4828_s14 = scalar_lea.vmem %s4770_s2, %s4293_s30  ;;  %s4141_s21 = smov 112  }
  0x41   : > { %3785 = vmatprep.subr.bf16.mxu0 %v4139_v2  ;;  %3793 = vmatprep.subr.mxu1 %v4139_v2  ;;  %v4361_v4 = vld [vmem:[%s4352_s7] sm:$0xff]  ;;  %s4142_s17 = smov 96   ;;  %vm725_vm3 = vcmask 130048   ;;  %vm876_vm4 = vcmask 64512   ;;  %s4143_s19 = smov 64  }
  0x42   : > { %3786 = vmatpush3.bf16.msra.mxu0 %v3899_v1  ;;  %3789 = vmatprep.mubr.msk.bf16.mxu0 %vm4140_vm1, %v4139_v2  ;;  %v652_v5 = vpack.c.bf16 %v4361_v4, %v4361_v4  ;;  %v3400_v6 = vld [vmem:[%s4828_s14] ss:$0 sm:$0xff]  ;;  %v3902_v40 = vld [vmem:[%s4309_s29 + $0x8] sm:$0xff]   ;;  %s4144_s28 = smov 16   ;;  %s4829_s23 = scalar_lea.vmem %s4772_s4, %s4293_s30 }
  0x43   : > { %3787 = vmatprep.subr.bf16.mxu0 %v4139_v2  ;;  %3795 = vmatprep.mubr.msk.f32.mxu1 %vm4140_vm1, %v4139_v2  ;;  %v3901_v39 = vld [vmem:[%s4309_s29] sm:$0xff]   ;;  %v1156_v63 = vld [vmem:[%s4324_s25 + $0x8] sm:$0xff]  ;;  %s4834_s16 = sld [smem:[#allocation25_spill]] }
  0x44   : > { %v3410_v48 = vld [vmem:[%s4829_s23] ss:$0 sm:$0xff]  ;;  %v1164_v1 = vld [vmem:[%s4324_s25 + $0x48] sm:$0xff] }
  0x45   : > { %v1155_v61 = vld [vmem:[%s4324_s25] sm:$0xff] }
  0x46   : > { %3788 = vmatpush3.bf16.msra.mxu0 %v3900_v3  ;;  %v1163_v62 = vld [vmem:[%s4324_s25 + $0x40] sm:$0xff]  ;;  %v3418_v3 = vcombine.low %v1156_v63, %v1164_v1 }
  0x47   : > { %3808 = vmatprep.subr.mxu0 %v4139_v2  ;;  %v3417_v0 = vcombine.high %v1155_v61, %v1163_v62 }
  0x49   : > { %3790 = vmatmul.mubr.msk.bf16.vlgmr.msra.gmra.mrb[0].mxu0 %vm676_vm2, %v652_v5  ;;  %v1171_v5 = vld [vmem:[%s4324_s25 + $0x80] sm:$0xff] }
  0x4a   : > { %3810 = vmatprep.mubr.msk.f32.mxu0 %vm4140_vm1, %v4139_v2 }
 0x11c   : > { %v714_v7 = vpop.f32.mrb[0].mxu0 }
 0x11d   : > { %v715_v8 = vadd.f32 %v3400_v6, %v714_v7  ;;  %v3791_v9 = vpop.f32.mrb[1].mxu0  ;;  %v1179_v6 = vld [vmem:[%s4324_s25 + $0xc0] sm:$0xff]  ;;  %v1172_v7 = vld [vmem:[%s4324_s25 + $0x88] sm:$0xff] }
 0x11e   : > { %v717_v10 = vpop.f32.mrb[2].mxu0  ;;  %v1180_v9 = vld [vmem:[%s4324_s25 + $0xc8] sm:$0xff] }
 0x11f   : > { %721 = vrot.lane.b32.xlu0 %v715_v8, %s4141_s21  ;;  %v3792_v11 = vpop.f32.mrb[3].mxu0  ;;  %v3432_v10 = vcombine.low %v1171_v5, %v1179_v6 }
 0x120   : > { %v3434_v11 = vcombine.low %v1172_v7, %v1180_v9 }
 0x123   : > { %723 = vrot.lane.b32.xlu0 %v715_v8, %s4142_s17 }
 0x191   : > { %v722_v12 = vpop.permute.xlu0 %721 }
 0x192   : > { %800 = vrot.lane.b32.xlu1 %v722_v12, %s4142_s17  ;;  %s3190_s17 = sshll.u32 %s4352_s7, 4  ;;  %s4713_s17 = int_to_ptr.vmem [resolvable:$true] %s3190_s17 }
 0x193   : > { %s4043_s30 = scalar_lea.vmem %s4713_s17, 128 }
 0x194   : > { %p4044_p1 = scmp.ne.s32.totalorder %s4713_s17, %s4043_s30 }
 0x195   : > { %v724_v13 = vpop.permute.xlu0 %723 }
 0x196   : > { %3794 = vmatpush3.xpose.msk.msra.mxu1 %vm725_vm3, %v724_v13  ;;  %v1157_v13 = vld [vmem:[%s4324_s25 + $0x10] sm:$0xff]  ;;  %p4045_p2 = pnand %p4044_p1, %p4266_p3 }
 0x197   : > { %3798 = vmatprep.subr.mxu1 %v4139_v2 }
 0x198   : > { %p4046_p4 = pneg %p4045_p2 }
 0x199   : > { %3796 = vmatmul.mubr.msk.f32.vlgmr.msra.gmra.mrb[0].mxu1 %vm725_vm3, %v715_v8 }
 0x19a   : > { %3800 = vmatprep.mubr.msk.f32.mxu1 %vm4140_vm1, %v4139_v2 }
 0x204   : > { %v801_v14 = vpop.permute.xlu1 %800 }
 0x205   : > { %3799 = vmatpush3.xpose.msk.msra.mxu1 %vm725_vm3, %v801_v14  ;;  %v1165_v14 = vld [vmem:[%s4324_s25 + $0x50] sm:$0xff] }
 0x206   : > { %3803 = vmatprep.subr.mxu1 %v4139_v2 }
 0x208   : > { %3801 = vmatmul.mubr.msk.f32.vlgmr.msra.gmra.mrb[2].mxu1 %vm725_vm3, %v722_v12 }
 0x209   : > { %3805 = vmatprep.mubr.msk.f32.mxu1 %vm4140_vm1, %v4139_v2 }
 0x26c   : > { %v796_v15 = vpop.f32.mrb[0].mxu1 }
 0x26d   : > { %v3797_v16 = vpop.f32.mrb[1].mxu1  ;;  %v877_v17 = vsel %vm876_vm4, %v796_v15, -inf }
 0x26e   : > { %878 = vmax.xlane.f32.xlu0 %v877_v17  ;;  %v3421_v16 = vcombine.high %v1157_v13, %v1165_v14  ;;  %v1166_v17 = vld [vmem:[%s4324_s25 + $0x58] sm:$0xff] }
 0x2db   : > { %v872_v18 = vpop.f32.mrb[2].mxu1 }
 0x2dc   : > { %v3802_v19 = vpop.f32.mrb[3].mxu1  ;;  %v880_v20 = vsel %vm876_vm4, %v872_v18, -inf }
 0x2dd   : > { %881 = vmax.xlane.f32.xlu1 %v880_v20  ;;  %v3420_v19 = vcombine.low %v1157_v13, %v1165_v14  ;;  %v3908_v13 = vld [vmem:[%s4330_s20 + $0xc8] sm:$0xff]  }
 0x2de   : > { %v3909_v14 = vld [vmem:[%s4330_s20 + $0x8] sm:$0xff]  }
 0x2ee   : > { %975 = vrot.lane.b32.xlu1 %v722_v12, %s4143_s19  ;;  %v3435_v12 = vcombine.high %v1172_v7, %v1180_v9  ;;  %v3904_v9 = vld [vmem:[%s4330_s20 + $0xc0] sm:$0xff]  }
 0x2fb   : > { %v879_v21 = vpop.xlane.xlu0 %878 }
 0x2fc   : > { %v883_v22 = vsub.f32 %v796_v15, %v879_v21  ;;  %v1158_v15 = vld [vmem:[%s4324_s25 + $0x18] sm:$0xff] }
 0x2fd   : > { %v3422_v20 = vcombine.low %v1158_v15, %v1166_v17  ;;  %v3423_v21 = vcombine.high %v1158_v15, %v1166_v17  ;;  %v3910_v15 = vld [vmem:[%s4330_s20 + $0x88] sm:$0xff]   ;;  %v3912_v17 = vld [vmem:[%s4330_s20 + $0xd0] sm:$0xff]  }
 0x2fe   : > { %v885_v25 = vmul.f32 1.442695, %v883_v22 }
 0x36a   : > { %v882_v23 = vpop.xlane.xlu1 %881 }
 0x36b   : > { %v884_v24 = vsub.f32 %v872_v18, %v882_v23  ;;  %v4145_v18 = vmov 0  }
 0x36d   : > { %v887_v26 = vmul.f32 1.442695, %v884_v24 }
 0x36e   : > { %v976_v27 = vpop.permute.xlu1 %975 }
 0x36f   : > { %4031 = vpow2.f32 %v887_v26  ;;  %3809 = vmatpush3.msra.mxu0 %v976_v27  ;;  %v3414_v26 = vld [vmem:[%s633_s0] ss:$0 sm:$0xff] }
 0x370   : > { %4033 = vpow2.f32 %v885_v25  ;;  %1434 = vmatprep.subr.bf16.mxu0 %v3417_v0  ;;  %v1178_v0 = vld [vmem:[%s4324_s25 + $0xb8] sm:$0xff] }
 0x379   : > { %v4032_v28 = vpop.eup %4031 }
 0x37a   : > { %v892_v29 = vsel %vm876_vm4, %v4032_v28, 0.0  ;;  %v4034_v30 = vpop.eup %4033 }
 0x37b   : > { %893 = vadd.xlane.f32.xlu0 %v892_v29  ;;  %v889_v31 = vsel %vm876_vm4, %v4034_v30, 0.0 }
 0x37f   : > { %890 = vadd.xlane.f32.xlu0 %v889_v31  ;;  %v1181_v31 = vld [vmem:[%s4324_s25 + $0xd0] sm:$0xff] }
 0x395   : > { %899 = vrot.lane.b32.xlu0 %v715_v8, %s4143_s19  ;;  %v3433_v8 = vcombine.high %v1171_v5, %v1179_v6 }
 0x408   : > { %v894_v32 = vpop.xlane.xlu0 %893 }
 0x409   : > { %4035 = vrcp.f32 %v894_v32  ;;  %v1174_v32 = vld [vmem:[%s4324_s25 + $0x98] sm:$0xff] }
 0x40c   : > { %v891_v33 = vpop.xlane.xlu0 %890 }
 0x40d   : > { %4037 = vrcp.f32 %v891_v33  ;;  %v1182_v33 = vld [vmem:[%s4324_s25 + $0xd8] sm:$0xff] }
 0x410   : > { %v900_v34 = vpop.permute.xlu0 %899 }
 0x411   : > { %3804 = vmatpush3.msra.mxu1 %v900_v34 }
 0x412   : > { %3813 = vmatprep.subr.bf16.mxu1 %v4139_v2 }
 0x413   : > { %v4036_v35 = vpop.eup %4035 }
 0x414   : > { %v898_v36 = vmul.f32 %v4036_v35, %v4032_v28  ;;  %v3415_v28 = vld [vmem:[%s636_s27] ss:$0 sm:$0xff] }
 0x416   : > { %3811 = vmatmul.mubr.msk.f32.vlgmr.msra.gmra.mrb[4].mxu0 %vm876_vm4, %v898_v36 }
 0x417   : > { %v4038_v37 = vpop.eup %4037  ;;  %1466 = vmatprep.mubr.bf16.mxu0 %v4145_v18 }
 0x418   : > { %v897_v38 = vmul.f32 %v4038_v37, %v4034_v30  ;;  %v1173_v30 = vld [vmem:[%s4324_s25 + $0x90] sm:$0xff]  ;;  %v3439_v37 = vcombine.high %v1174_v32, %v1182_v33 }
 0x419   : > { %v3437_v36 = vcombine.high %v1173_v30, %v1181_v31 }
 0x41a   : > { %3806 = vmatmul.mubr.msk.f32.vlgmr.msra.gmra.mrb[4].mxu1 %vm876_vm4, %v897_v38  ;;  %v1159_v38 = vld [vmem:[%s4324_s25 + $0x20] sm:$0xff] }
 0x41b   : > { %3817 = vmatprep.mubr.msk.bf16.mxu1 %vm4140_vm1, %v4139_v2  ;;  %3814 = vmatpush3.bf16.msra.mxu1 %v3901_v39  ;;  %v1167_v39 = vld [vmem:[%s4324_s25 + $0x60] sm:$0xff] }
 0x41c   : > { %3815 = vmatprep.subr.bf16.mxu1 %v4139_v2  ;;  %v3416_v2 = vcombine.low %v1155_v61, %v1163_v62  ;;  %v1177_v62 = vld [vmem:[%s4324_s25 + $0xb0] sm:$0xff] }
 0x41e   : > { %1435 = vmatpush1.bf16.msra.mxu0 %v3416_v2 }
 0x41f   : > { %3816 = vmatpush3.bf16.msra.mxu1 %v3902_v40  ;;  %1436 = vmatprep.subr.bf16.mxu0 %v3433_v8  ;;  %v1160_v40 = vld [vmem:[%s4324_s25 + $0x28] sm:$0xff]  ;;  %v3903_v8 = vld [vmem:[%s4330_s20 + $0x40] sm:$0xff]  }
 0x422   : > { %1437 = vmatpush1.bf16.msra.mxu0 %v3432_v10  ;;  %v3905_v10 = vld [vmem:[%s4330_s20] sm:$0xff]  }
 0x423   : > { %1516 = vmatprep.subr.bf16.mxu0 %v3421_v16  ;;  %v3911_v16 = vld [vmem:[%s4330_s20 + $0x50] sm:$0xff]  }
 0x4e9   : > { %v1047_v41 = vpop.f32.mrb[4].mxu0 }
 0x4ea   : > { %1052 = vrot.lane.b32.xlu1 %v1047_v41, %s4144_s28  ;;  %v3812_v42 = vpop.f32.mrb[5].mxu0  ;;  %v1168_v41 = vld [vmem:[%s4324_s25 + $0x68] sm:$0xff] }
 0x4eb   : > { %v3436_v42 = vcombine.low %v1173_v30, %v1181_v31  ;;  %v3925_v30 = vld [vmem:[%s4330_s20 + $0x28] sm:$0xff]  }
 0x4ec   : > { %v3926_v31 = vld [vmem:[%s4330_s20 + $0xa8] sm:$0xff]  }
 0x4ed   : > { %v971_v43 = vpop.f32.mrb[4].mxu1 }
 0x4ee   : > { %v3807_v44 = vpop.f32.mrb[5].mxu1 }
 0x4ef   : > { %v3425_v44 = vcombine.high %v1159_v38, %v1167_v39 }
 0x55c   : > { %v1053_v45 = vpop.permute.xlu1 %1052 }
 0x55d   : > { %v1055_v46 = vsel %vm725_vm3, %v971_v43, %v1053_v45  ;;  %v3438_v43 = vcombine.low %v1174_v32, %v1182_v33  ;;  %v3427_v45 = vcombine.high %v1160_v40, %v1168_v41  ;;  %v3927_v32 = vld [vmem:[%s4330_s20 + $0x70] sm:$0xff]  }
 0x55e   : > { %v1056_v47 = vpack.c.bf16 %v1055_v46, %v1055_v46  ;;  %v1175_v46 = vld [vmem:[%s4324_s25 + $0xa0] sm:$0xff]  ;;  %v3928_v33 = vld [vmem:[%s4330_s20 + $0xf0] sm:$0xff]  }
 0x560   : > { %3818 = vmatmul.mubr.msk.bf16.vlgmr.msra.gmra.mrb[8].mxu1 %vm676_vm2, %v1056_v47  ;;  %v1183_v47 = vld [vmem:[%s4324_s25 + $0xe0] sm:$0xff] }
 0x561   : > { %1507 = vmatprep.mubr.bf16.mxu1 %v4145_v18 }
 0x633   : > { %v1117_v49 = vpop.f32.mrb[8].mxu1 }
 0x634   : > { %v1118_v50 = vadd.f32 %v3410_v48, %v1117_v49  ;;  %v3819_v51 = vpop.f32.mrb[9].mxu1  ;;  %v1176_v48 = vld [vmem:[%s4324_s25 + $0xa8] sm:$0xff] }
 0x635   : > { %v1120_v52 = vpop.f32.mrb[10].mxu1  ;;  %v1184_v49 = vld [vmem:[%s4324_s25 + $0xe8] sm:$0xff]  ;;  %v3426_v51 = vcombine.low %v1160_v40, %v1168_v41  ;;  %v3934_v40 = vld [vmem:[%s4330_s20 + $0xb8] sm:$0xff]   ;;  %v3935_v41 = vld [vmem:[%s4330_s20 + $0x140] sm:$0xff]  }
 0x636   : > { %v3820_v53 = vpop.f32.mrb[11].mxu1  ;;  %v1123_v54 = vadd.f32 %v1118_v50, %v4361_v4  ;;  %v3419_v4 = vcombine.high %v1156_v63, %v1164_v1  ;;  %v3424_v50 = vcombine.low %v1159_v38, %v1167_v39  ;;  %v3441_v52 = vcombine.high %v1175_v46, %v1183_v47  ;;  %v1185_v63 = vld [vmem:[%s4324_s25 + $0xf0] sm:$0xff]  ;;  %v1186_v1 = vld [vmem:[%s4324_s25 + $0xf8] sm:$0xff] }
 0x637   : > { %v3443_v53 = vcombine.high %v1176_v48, %v1184_v49  ;;  %v3447_v5 = vcombine.high %v1178_v0, %v1186_v1  ;;  %v3444_v6 = vcombine.low %v1177_v62, %v1185_v63  ;;  %v3446_v7 = vcombine.low %v1178_v0, %v1186_v1  ;;  %v3932_v38 = vld [vmem:[%s4330_s20 + $0xf8] sm:$0xff]  }
 0x638   : > { %v1126_v55 = vsel %vm676_vm2, %v1123_v54, 0.0  ;;  %1475 = vmatprep.subr.bf16.mxu1 %v3419_v4  ;;  %v3445_v4 = vcombine.high %v1177_v62, %v1185_v63  ;;  %v3933_v39 = vld [vmem:[%s4330_s20 + $0x38] sm:$0xff]  }
 0x639   : > { %1127 = vadd.xlane.f32.xlu1 %v1126_v55  ;;  %1476 = vmatpush1.bf16.msra.mxu1 %v3418_v3  ;;  %v1169_v55 = vld [vmem:[%s4324_s25 + $0x70] sm:$0xff] }
 0x63a   : > { %1477 = vmatprep.subr.bf16.mxu1 %v3435_v12  ;;  %v3907_v12 = vld [vmem:[%s4330_s20 + $0x48] sm:$0xff]  }
 0x63d   : > { %1478 = vmatpush1.bf16.msra.mxu1 %v3434_v11  ;;  %v3906_v11 = vld [vmem:[%s4330_s20 + $0x80] sm:$0xff]  }
 0x63e   : > { %1557 = vmatprep.subr.bf16.mxu1 %v3423_v21  ;;  %v3916_v21 = vld [vmem:[%s4330_s20 + $0xd8] sm:$0xff]  }
 0x6c6   : > { %v1128_v56 = vpop.xlane.xlu1 %1127 }
 0x6c7   : > { %v1130_v57 = vmul.f32 0.03125, %v1128_v56  ;;  %v1162_v56 = vld [vmem:[%s4324_s25 + $0x38] sm:$0xff] }
 0x6c9   : > { %v1131_v58 = vsub.f32 %v1123_v54, %v1130_v57  ;;  %v1161_v54 = vld [vmem:[%s4324_s25 + $0x30] sm:$0xff]  ;;  %v1170_v57 = vld [vmem:[%s4324_s25 + $0x78] sm:$0xff] }
 0x6ca   : > { %v3431_v61 = vcombine.high %v1162_v56, %v1170_v57  ;;  %v3428_v2 = vcombine.low %v1161_v54, %v1169_v55  ;;  %v3430_v3 = vcombine.low %v1162_v56, %v1170_v57 }
 0x6cb   : > { %v1132_v59 = vmul.f32 %v1131_v58, %v1131_v58 }
 0x6cd   : > { %v1133_v60 = vsel %vm676_vm2, %v1132_v59, 0.0  ;;  %v3442_v59 = vcombine.low %v1176_v48, %v1184_v49 }
 0x6ce   : > { %1134 = vadd.xlane.f32.xlu0 %v1133_v60  ;;  %v3429_v60 = vcombine.high %v1161_v54, %v1169_v55 }
 0x75b   : > { %v1135_v22 = vpop.xlane.xlu0 %1134 }
 0x75c   : > { %v1136_v23 = vmul.f32 0.03125, %v1135_v22  ;;  %v3917_v22 = vld [vmem:[%s4330_s20 + $0x18] sm:$0xff]  }
 0x75e   : > { %v1137_v24 = vadd.f32 1e-05, %v1136_v23  ;;  %v3918_v23 = vld [vmem:[%s4330_s20 + $0x98] sm:$0xff]  }
 0x760   : > { %4039 = vrsqrt.f32 %v1137_v24  ;;  %v3919_v24 = vld [vmem:[%s4330_s20 + $0x60] sm:$0xff]  }
 0x76a   : > { %v4040_v25 = vpop.eup %4039 }
 0x76b   : > { %v1139_v27 = vmul.f32 %v4040_v25, %v1131_v58  ;;  %v3440_v58 = vcombine.low %v1175_v46, %v1183_v47  ;;  %v3920_v25 = vld [vmem:[%s4330_s20 + $0xe0] sm:$0xff]   ;;  %v4519_v46 = vld [vmem:[%s4319_s12 + $0x8] sm:$0xff] }
 0x76d   : > { %v1146_v29 = vmul.f32 %v3414_v26, %v1139_v27  ;;  %v3921_v26 = vld [vmem:[%s4330_s20 + $0x20] sm:$0xff]  }
 0x76e   : > { %v3922_v27 = vld [vmem:[%s4330_s20 + $0xa0] sm:$0xff]  }
 0x76f   : > { %v4437_v34 = vadd.f32 %v3415_v28, %v1146_v29  ;;  %v3923_v28 = vld [vmem:[%s4330_s20 + $0x68] sm:$0xff]  }
 0x770   : > { %v3924_v29 = vld [vmem:[%s4330_s20 + $0xe8] sm:$0xff]  }
 0x771   : > { %v4441_v35 = vpack.c.bf16 %v4437_v34, %v4437_v34 }
 0x773   : > { %3448 = vmatmul.mubr.msk.bf16.vlgmr.msra.gmra.mrb[8].mxu0 %vm676_vm2, %v4441_v35  ;;  %3449 = vmatmul.mubr.msk.bf16.vlgmr.msra.gmra.mrb[12].mxu1 %vm676_vm2, %v4441_v35 }
 0x774   : > { %1517 = vmatpush1.bf16.msra.mxu0 %v3420_v19  ;;  %1558 = vmatpush1.bf16.msra.mxu1 %v3422_v20  ;;  %v3914_v19 = vld [vmem:[%s4330_s20 + $0x90] sm:$0xff]   ;;  %v3915_v20 = vld [vmem:[%s4330_s20 + $0x58] sm:$0xff]  }
 0x775   : > { %1518 = vmatprep.subr.bf16.mxu0 %v3437_v36  ;;  %1559 = vmatprep.subr.bf16.mxu1 %v3439_v37  ;;  %v3930_v36 = vld [vmem:[%s4330_s20 + $0xb0] sm:$0xff]   ;;  %v3931_v37 = vld [vmem:[%s4330_s20 + $0x78] sm:$0xff]  }
 0x776   : > { %1548 = vmatprep.mubr.bf16.mxu0 %v4145_v18  ;;  %1589 = vmatprep.mubr.bf16.mxu1 %v4145_v18 }
 0x778   : > { %1519 = vmatpush1.bf16.msra.mxu0 %v3436_v42  ;;  %1560 = vmatpush1.bf16.msra.mxu1 %v3438_v43  ;;  %v3936_v42 = vld [vmem:[%s4330_s20 + $0x1c0] sm:$0xff]   ;;  %v1191_v43 = vlaneseq }
 0x779   : > { %1598 = vmatprep.subr.bf16.mxu0 %v3425_v44  ;;  %1639 = vmatprep.subr.bf16.mxu1 %v3427_v45 }
 0x77a   : > { %v4515_v44 = vshrl.u32 %v1191_v43, 7  ;;  %v3946_v43 = vld [vmem:[%s4330_s20 + $0x190] sm:$0xff]  }
 0x77b   : > { %3450 = vmatmul.mubr.msk.bf16.vlgmr.msra.gmra.mrb[12].mxu0 %vm676_vm2, %v4441_v35  ;;  %3451 = vmatmul.mubr.msk.bf16.vlgmr.msra.gmra.mrb[16].mxu1 %vm676_vm2, %v4441_v35 }
 0x77c   : > { %1599 = vmatpush1.bf16.msra.mxu0 %v3424_v50  ;;  %1640 = vmatpush1.bf16.msra.mxu1 %v3426_v51  ;;  %v1217_v45 = vsub.s32 6, %v4515_v44  ;;  %v1193_v48 = vsub.s32 0, %v4515_v44  ;;  %v1201_v49 = vsub.s32 2, %v4515_v44  ;;  %v4529_v50 = vld [vmem:[%s4319_s12] sm:$0xff]  ;;  %v1197_v51 = vsub.s32 1, %v4515_v44 }
 0x77d   : > { %1600 = vmatprep.subr.bf16.mxu0 %v3441_v52  ;;  %1641 = vmatprep.subr.bf16.mxu1 %v3443_v53  ;;  %v1205_v52 = vsub.s32 3, %v4515_v44 }
 0x77e   : > { %1630 = vmatprep.mubr.bf16.mxu0 %v4145_v18  ;;  %1671 = vmatprep.mubr.bf16.mxu1 %v4145_v18  ;;  %v4524_v47 = vrot.slane %v4519_v46, %v1217_v45  ;;  %v1194_v53 = vrot.slane %v4529_v50, %v1193_v48  ;;  %v1202_v54 = vrot.slane %v4529_v50, %v1201_v49 }
 0x77f   : > { %v1198_v55 = vrot.slane %v4529_v50, %v1197_v51  ;;  %v1206_v56 = vrot.slane %v4529_v50, %v1205_v52 }
 0x780   : > { %1601 = vmatpush1.bf16.msra.mxu0 %v3440_v58  ;;  %1642 = vmatpush1.bf16.msra.mxu1 %v3442_v59 }
 0x781   : > { %1680 = vmatprep.subr.bf16.mxu0 %v3429_v60  ;;  %1721 = vmatprep.subr.bf16.mxu1 %v3431_v61 }
 0x783   : > { %3452 = vmatmul.mubr.msk.bf16.vlgmr.msra.gmra.mrb[16].mxu0 %vm676_vm2, %v4441_v35  ;;  %3453 = vmatmul.mubr.msk.bf16.vlgmr.msra.gmra.mrb[20].mxu1 %vm676_vm2, %v4441_v35 }
 0x784   : > { %1681 = vmatpush1.bf16.msra.mxu0 %v3428_v2  ;;  %1722 = vmatpush1.bf16.msra.mxu1 %v3430_v3  ;;  %v1213_v3 = vsub.s32 5, %v4515_v44 }
 0x785   : > { %1682 = vmatprep.subr.bf16.mxu0 %v3445_v4  ;;  %1723 = vmatprep.subr.bf16.mxu1 %v3447_v5  ;;  %v1221_v4 = vsub.s32 7, %v4515_v44 }
 0x786   : > { %1712 = vmatprep.mubr.bf16.mxu0 %v4145_v18  ;;  %1753 = vmatprep.mubr.bf16.mxu1 %v4145_v18  ;;  %v3913_v18 = vld [vmem:[%s4330_s20 + $0x10] sm:$0xff]  }
 0x788   : > { %1683 = vmatpush1.bf16.msra.mxu0 %v3444_v6  ;;  %1724 = vmatpush1.bf16.msra.mxu1 %v3446_v7 }
 0x789   : > { %3609 = vmatprep.subr.bf16.mxu0 %v3903_v8  ;;  %3631 = vmatprep.subr.bf16.mxu1 %v3904_v9 }
 0x78b   : > { %3454 = vmatmul.mubr.msk.bf16.vlgmr.msra.gmra.mrb[20].mxu0 %vm676_vm2, %v4441_v35  ;;  %3455 = vmatmul.mubr.msk.bf16.vlgmr.msra.gmra.mrb[24].mxu1 %vm676_vm2, %v4441_v35  ;;  %v3929_v35 = vld [vmem:[%s4330_s20 + $0x30] sm:$0xff]  }
 0x78c   : > { %3610 = vmatpush3.bf16.msra.mxu0 %v3905_v10  ;;  %3632 = vmatpush3.bf16.msra.mxu1 %v3906_v11 }
 0x78d   : > { %3611 = vmatprep.subr.bf16.mxu0 %v3907_v12  ;;  %3633 = vmatprep.subr.bf16.mxu1 %v3908_v13  ;;  %v1214_v13 = vrot.slane %v4529_v50, %v1213_v3 }
 0x790   : > { %3612 = vmatpush3.bf16.msra.mxu0 %v3909_v14  ;;  %3634 = vmatpush3.bf16.msra.mxu1 %v3910_v15  ;;  %v1222_v14 = vrot.slane %v4529_v50, %v1221_v4  ;;  %v3937_v15 = vld [vmem:[%s4330_s20 + $0x100] sm:$0xff]  }
 0x791   : > { %3613 = vmatprep.subr.bf16.mxu0 %v3911_v16  ;;  %3635 = vmatprep.subr.bf16.mxu1 %v3912_v17  ;;  %v3938_v16 = vld [vmem:[%s4330_s20 + $0x180] sm:$0xff]  }
 0x794   : > { %3614 = vmatpush3.bf16.msra.mxu0 %v3913_v18  ;;  %3636 = vmatpush3.bf16.msra.mxu1 %v3914_v19  ;;  %v3939_v19 = vld [vmem:[%s4330_s20 + $0x148] sm:$0xff]  }
 0x795   : > { %3615 = vmatprep.subr.bf16.mxu0 %v3915_v20  ;;  %3637 = vmatprep.subr.bf16.mxu1 %v3916_v21  ;;  %v3940_v20 = vld [vmem:[%s4330_s20 + $0x1c8] sm:$0xff]  }
 0x798   : > { %3616 = vmatpush3.bf16.msra.mxu0 %v3917_v22  ;;  %3638 = vmatpush3.bf16.msra.mxu1 %v3918_v23 }
 0x799   : > { %3617 = vmatprep.subr.bf16.mxu0 %v3919_v24  ;;  %3639 = vmatprep.subr.bf16.mxu1 %v3920_v25 }
 0x79c   : > { %3618 = vmatpush3.bf16.msra.mxu0 %v3921_v26  ;;  %3640 = vmatpush3.bf16.msra.mxu1 %v3922_v27 }
 0x79d   : > { %3619 = vmatprep.subr.bf16.mxu0 %v3923_v28  ;;  %3641 = vmatprep.subr.bf16.mxu1 %v3924_v29  ;;  %v3941_v29 = vld [vmem:[%s4330_s20 + $0x108] sm:$0xff]  }
 0x7a0   : > { %3620 = vmatpush3.bf16.msra.mxu0 %v3925_v30  ;;  %3642 = vmatpush3.bf16.msra.mxu1 %v3926_v31  ;;  %v3942_v30 = vld [vmem:[%s4330_s20 + $0x188] sm:$0xff]  }
 0x7a1   : > { %3621 = vmatprep.subr.bf16.mxu0 %v3927_v32  ;;  %3643 = vmatprep.subr.bf16.mxu1 %v3928_v33  ;;  %v3943_v33 = vld [vmem:[%s4330_s20 + $0x150] sm:$0xff]  }
 0x7a4   : > { %3622 = vmatpush3.bf16.msra.mxu0 %v3929_v35  ;;  %3644 = vmatpush3.bf16.msra.mxu1 %v3930_v36  ;;  %v3944_v35 = vld [vmem:[%s4330_s20 + $0x1d0] sm:$0xff]  }
 0x7a5   : > { %3623 = vmatprep.subr.bf16.mxu0 %v3931_v37  ;;  %3645 = vmatprep.subr.bf16.mxu1 %v3932_v38  ;;  %v1226_v38 = vrot.slane %v4519_v46, %v1193_v48 }
 0x7a8   : > { %3624 = vmatpush3.bf16.msra.mxu0 %v3933_v39  ;;  %3646 = vmatpush3.bf16.msra.mxu1 %v3934_v40  ;;  %v1234_v39 = vrot.slane %v4519_v46, %v1201_v49 }
 0x7a9   : > { %3653 = vmatprep.subr.bf16.mxu0 %v3935_v41  ;;  %3675 = vmatprep.subr.bf16.mxu1 %v3936_v42  ;;  %v3945_v42 = vld [vmem:[%s4330_s20 + $0x110] sm:$0xff]  }
 0x846   : > { %v1468_v57 = vpop.f32.mrb[8].mxu0  ;;  %v1509_v58 = vpop.f32.mrb[12].mxu1 }
 0x847   : > { %v1469_v59 = vadd.f32 %v1468_v57, %v1194_v53  ;;  %v1510_v60 = vadd.f32 %v1509_v58, %v1202_v54  ;;  %v1470_v61 = vpop.f32.mrb[9].mxu0  ;;  %v1511_v62 = vpop.f32.mrb[13].mxu1  ;;  %v3947_v53 = vld [vmem:[%s4330_s20 + $0x158] sm:$0xff]  }
 0x848   : > { %v1471_v63 = vadd.f32 %v1470_v61, %v1198_v55  ;;  %v1512_v0 = vadd.f32 %v1511_v62, %v1206_v56  ;;  %v1472_v1 = vpop.f32.mrb[10].mxu0  ;;  %v1513_v2 = vpop.f32.mrb[14].mxu1  ;;  %v3948_v54 = vld [vmem:[%s4330_s20 + $0x1d8] sm:$0xff]  }
 0x849   : > { %v1762_v5 = vmax.f32 %v1469_v59, 0.0  ;;  %v1764_v6 = vmax.f32 %v1510_v60, 0.0  ;;  %v1473_v7 = vpop.f32.mrb[11].mxu0  ;;  %v1514_v8 = vpop.f32.mrb[15].mxu1  ;;  %v3949_v61 = vld [vmem:[%s4330_s20 + $0x118] sm:$0xff]   ;;  %v3951_v2 = vld [vmem:[%s4330_s20 + $0x160] sm:$0xff]  }
 0x84a   : > { %v1763_v9 = vmax.f32 %v1471_v63, 0.0  ;;  %v1765_v10 = vmax.f32 %v1512_v0, 0.0  ;;  %v3950_v62 = vld [vmem:[%s4330_s20 + $0x198] sm:$0xff]   ;;  %v1209_v63 = vsub.s32 4, %v4515_v44  ;;  %v3953_v7 = vld [vmem:[%s4330_s20 + $0x120] sm:$0xff]  }
 0x84b   : > { %v1778_v17 = vpack.c.bf16 %v1762_v5, %v1762_v5  ;;  %v1780_v18 = vpack.c.bf16 %v1764_v6, %v1764_v6  ;;  %v3952_v5 = vld [vmem:[%s4330_s20 + $0x1e0] sm:$0xff]   ;;  %v3997_v44 = vld [vmem:[%s4330_s20 + $0x238] sm:$0xff]  }
 0x84c   : > { %v1779_v11 = vpack.c.bf16 %v1763_v9, %v1763_v9  ;;  %v1781_v12 = vpack.c.bf16 %v1765_v10, %v1765_v10  ;;  %v1242_v6 = vrot.slane %v4519_v46, %v1209_v63  ;;  %v3954_v8 = vld [vmem:[%s4330_s20 + $0x1a0] sm:$0xff]   ;;  %v3955_v9 = vld [vmem:[%s4330_s20 + $0x168] sm:$0xff]  }
 0x84d   : > { %v3956_v10 = vld [vmem:[%s4330_s20 + $0x1e8] sm:$0xff]  }
 0x84e   : > { %v4553_v21 = vpop.f32.mrb[12].mxu0  ;;  %v4555_v22 = vpop.f32.mrb[16].mxu1  ;;  %2857 = vmatprep.mubr.bf16.mxu0 %v1779_v11  ;;  %2897 = vmatprep.mubr.bf16.mxu1 %v1781_v12 }
 0x84f   : > { %v1552_v23 = vpop.f32.mrb[13].mxu0  ;;  %v1593_v24 = vpop.f32.mrb[17].mxu1  ;;  %2858 = vmatmul.mubr.bf16.vlgmr.msra.gmra.mrb[24].mxu0 %v1778_v17  ;;  %2898 = vmatmul.mubr.bf16.vlgmr.msra.gmra.mrb[28].mxu1 %v1780_v18 }
 0x850   : > { %v1553_v25 = vadd.f32 %v1552_v23, %v1214_v13  ;;  %v1594_v26 = vadd.f32 %v1593_v24, %v1222_v14  ;;  %3654 = vmatpush3.bf16.msra.mxu0 %v3937_v15  ;;  %3676 = vmatpush3.bf16.msra.mxu1 %v3938_v16  ;;  %v1554_v27 = vpop.f32.mrb[14].mxu0  ;;  %v1595_v28 = vpop.f32.mrb[18].mxu1  ;;  %v1210_v23 = vrot.slane %v4529_v50, %v1209_v63  ;;  %v3978_v63 = vld [vmem:[%s4330_s20 + $0x290] sm:$0xff]  }
 0x851   : > { %v1555_v31 = vpop.f32.mrb[15].mxu0  ;;  %v1596_v32 = vpop.f32.mrb[19].mxu1  ;;  %3655 = vmatprep.subr.bf16.mxu0 %v3939_v19  ;;  %3677 = vmatprep.subr.bf16.mxu1 %v3940_v20  ;;  %v3957_v19 = vld [vmem:[%s4330_s20 + $0x128] sm:$0xff]   ;;  %v3960_v27 = vld [vmem:[%s4330_s20 + $0x1f0] sm:$0xff]   ;;  %v1230_v28 = vrot.slane %v4519_v46, %v1197_v51  ;;  %v3964_v51 = vld [vmem:[%s4330_s20 + $0x1f8] sm:$0xff]  }
 0x852   : > { %v1767_v36 = vmax.f32 %v1553_v25, 0.0  ;;  %v1769_v37 = vmax.f32 %v1594_v26, 0.0  ;;  %v3958_v20 = vld [vmem:[%s4330_s20 + $0x1a8] sm:$0xff]   ;;  %v3959_v26 = vld [vmem:[%s4330_s20 + $0x170] sm:$0xff]   ;;  %v3963_v32 = vld [vmem:[%s4330_s20 + $0x178] sm:$0xff]  }
 0x854   : > { %v1783_v40 = vpack.c.bf16 %v1767_v36, %v1767_v36  ;;  %v1785_v41 = vpack.c.bf16 %v1769_v37, %v1769_v37  ;;  %3656 = vmatpush3.bf16.msra.mxu0 %v3941_v29  ;;  %3678 = vmatpush3.bf16.msra.mxu1 %v3942_v30  ;;  %v1238_v29 = vrot.slane %v4519_v46, %v1205_v52  ;;  %v3965_v52 = vld [vmem:[%s4330_s20 + $0x138] sm:$0xff]  }
 0x855   : > { %3657 = vmatprep.subr.bf16.mxu0 %v3943_v33  ;;  %3679 = vmatprep.subr.bf16.mxu1 %v3944_v35  ;;  %v1551_v30 = vadd.f32 %v4553_v21, %v1210_v23  ;;  %v3966_v36 = vld [vmem:[%s4330_s20 + $0x1b8] sm:$0xff]   ;;  %v3967_v21 = vld [vmem:[%s4330_s20 + $0x240] sm:$0xff]   ;;  %v1254_v23 = vrot.slane %v4519_v46, %v1221_v4 }
 0x856   : > { %v1632_v55 = vpop.f32.mrb[16].mxu0  ;;  %v1673_v56 = vpop.f32.mrb[20].mxu1  ;;  %2937 = vmatprep.mubr.bf16.mxu0 %v1783_v40  ;;  %2977 = vmatprep.mubr.bf16.mxu1 %v1785_v41  ;;  %v3969_v41 = vld [vmem:[%s4330_s20 + $0x200] sm:$0xff]   ;;  %v3998_v4 = vld [vmem:[%s4330_s20 + $0x2b8] sm:$0xff]  }
 0x857   : > { %v4567_v48 = vadd.f32 %v1632_v55, %v1226_v38  ;;  %v4569_v49 = vadd.f32 %v1673_v56, %v1234_v39  ;;  %v1634_v57 = vpop.f32.mrb[17].mxu0  ;;  %v1675_v58 = vpop.f32.mrb[21].mxu1  ;;  %v1766_v37 = vmax.f32 %v1551_v30, 0.0  ;;  %v3971_v55 = vld [vmem:[%s4330_s20 + $0x248] sm:$0xff]  }
 0x858   : > { %3658 = vmatpush3.bf16.msra.mxu0 %v3945_v42  ;;  %3680 = vmatpush3.bf16.msra.mxu1 %v3946_v43  ;;  %v1636_v59 = vpop.f32.mrb[18].mxu0  ;;  %v1677_v60 = vpop.f32.mrb[22].mxu1  ;;  %v1635_v33 = vadd.f32 %v1634_v57, %v1230_v28  ;;  %v1676_v35 = vadd.f32 %v1675_v58, %v1238_v29  ;;  %v3972_v56 = vld [vmem:[%s4330_s20 + $0x2c8] sm:$0xff]   ;;  %v3999_v28 = vld [vmem:[%s4330_s20 + $0x340] sm:$0xff]  }
 0x859   : > { %v1637_v0 = vpop.f32.mrb[19].mxu0  ;;  %v1678_v1 = vpop.f32.mrb[23].mxu1  ;;  %3659 = vmatprep.subr.bf16.mxu0 %v3947_v53  ;;  %3681 = vmatprep.subr.bf16.mxu1 %v3948_v54  ;;  %v1782_v42 = vpack.c.bf16 %v1766_v37, %v1766_v37  ;;  %v3970_v53 = vld [vmem:[%s4330_s20 + $0x280] sm:$0xff]   ;;  %v3973_v58 = vld [vmem:[%s4330_s20 + $0x208] sm:$0xff]   ;;  %v3975_v60 = vld [vmem:[%s4330_s20 + $0x250] sm:$0xff]   ;;  %v1772_v29 = vmax.f32 %v4569_v49, 0.0 }
 0x85a   : > { %v1771_v39 = vmax.f32 %v1635_v33, 0.0  ;;  %v1773_v40 = vmax.f32 %v1676_v35, 0.0  ;;  %v3974_v59 = vld [vmem:[%s4330_s20 + $0x288] sm:$0xff]   ;;  %v3979_v0 = vld [vmem:[%s4330_s20 + $0x258] sm:$0xff]   ;;  %v4008_v37 = vld [vmem:[%s4330_s20 + $0x3d0] sm:$0xff]  }
 0x85b   : > { %v3980_v1 = vld [vmem:[%s4330_s20 + $0x2d8] sm:$0xff]   ;;  %v4004_v49 = vld [vmem:[%s4330_s20 + $0x3c8] sm:$0xff]  }
 0x85c   : > { %3660 = vmatpush3.bf16.msra.mxu0 %v3949_v61  ;;  %3682 = vmatpush3.bf16.msra.mxu1 %v3950_v62  ;;  %v1787_v54 = vpack.c.bf16 %v1771_v39, %v1771_v39  ;;  %v1789_v57 = vpack.c.bf16 %v1773_v40, %v1773_v40  ;;  %v3976_v61 = vld [vmem:[%s4330_s20 + $0x2d0] sm:$0xff]   ;;  %v4005_v35 = vld [vmem:[%s4330_s20 + $0x308] sm:$0xff]   ;;  %v4012_v39 = vld [vmem:[%s4330_s20 + $0x3d8] sm:$0xff]  }
 0x85d   : > { %3661 = vmatprep.subr.bf16.mxu0 %v3951_v2  ;;  %3683 = vmatprep.subr.bf16.mxu1 %v3952_v5  ;;  %v3977_v62 = vld [vmem:[%s4330_s20 + $0x210] sm:$0xff]   ;;  %v3981_v2 = vld [vmem:[%s4330_s20 + $0x218] sm:$0xff]  }
 0x85e   : > { %v1714_v11 = vpop.f32.mrb[20].mxu0  ;;  %v1755_v12 = vpop.f32.mrb[24].mxu1  ;;  %v3982_v5 = vld [vmem:[%s4330_s20 + $0x298] sm:$0xff]  }
 0x85f   : > { %v4581_v13 = vadd.f32 %v1714_v11, %v1242_v6  ;;  %v4584_v14 = vadd.f32 %v1755_v12, %v4524_v47  ;;  %v4586_v15 = vpop.f32.mrb[21].mxu0  ;;  %v4588_v16 = vpop.f32.mrb[25].mxu1  ;;  %v1218_v47 = vrot.slane %v4529_v50, %v1217_v45  ;;  %v3961_v45 = vld [vmem:[%s4330_s20 + $0x130] sm:$0xff]   ;;  %v3983_v6 = vld [vmem:[%s4330_s20 + $0x260] sm:$0xff]   ;;  %v3988_v11 = vld [vmem:[%s4330_s20 + $0x2e8] sm:$0xff]  }
 0x860   : > { %3662 = vmatpush3.bf16.msra.mxu0 %v3953_v7  ;;  %3684 = vmatpush3.bf16.msra.mxu1 %v3954_v8  ;;  %v1718_v17 = vpop.f32.mrb[22].mxu0  ;;  %v1759_v18 = vpop.f32.mrb[26].mxu1  ;;  %v3962_v50 = vld [vmem:[%s4330_s20 + $0x1b0] sm:$0xff]   ;;  %v3984_v7 = vld [vmem:[%s4330_s20 + $0x2e0] sm:$0xff]   ;;  %v3989_v12 = vld [vmem:[%s4330_s20 + $0x228] sm:$0xff]  }
 0x861   : > { %v1719_v24 = vpop.f32.mrb[23].mxu0  ;;  %v1760_v25 = vpop.f32.mrb[27].mxu1  ;;  %3663 = vmatprep.subr.bf16.mxu0 %v3955_v9  ;;  %3685 = vmatprep.subr.bf16.mxu1 %v3956_v10  ;;  %v1592_v31 = vadd.f32 %v4555_v22, %v1218_v47  ;;  %v3968_v22 = vld [vmem:[%s4330_s20 + $0x2c0] sm:$0xff]   ;;  %v3987_v10 = vld [vmem:[%s4330_s20 + $0x268] sm:$0xff]   ;;  %v3991_v18 = vld [vmem:[%s4330_s20 + $0x270] sm:$0xff]  }
 0x862   : > { %v3985_v8 = vld [vmem:[%s4330_s20 + $0x220] sm:$0xff]   ;;  %v3990_v17 = vld [vmem:[%s4330_s20 + $0x2a8] sm:$0xff]   ;;  %v3993_v47 = vld [vmem:[%s4330_s20 + $0x230] sm:$0xff]  }
 0x863   : > { %v1768_v38 = vmax.f32 %v1592_v31, 0.0  ;;  %v3986_v9 = vld [vmem:[%s4330_s20 + $0x2a0] sm:$0xff]   ;;  %v3994_v24 = vld [vmem:[%s4330_s20 + $0x2b0] sm:$0xff]   ;;  %v3995_v25 = vld [vmem:[%s4330_s20 + $0x278] sm:$0xff]   ;;  %v1788_v31 = vpack.c.bf16 %v1772_v29, %v1772_v29 }
 0x864   : > { %3664 = vmatpush3.bf16.msra.mxu0 %v3957_v19  ;;  %3686 = vmatpush3.bf16.msra.mxu1 %v3958_v20  ;;  %v3992_v19 = vld [vmem:[%s4330_s20 + $0x2f0] sm:$0xff]   ;;  %v1246_v20 = vrot.slane %v4519_v46, %v1213_v3  ;;  %v1758_v3 = vadd.f32 %v4588_v16, %v1254_v23  ;;  %v1770_v46 = vmax.f32 %v4567_v48, 0.0  ;;  %v4002_v48 = vld [vmem:[%s4330_s20 + $0x380] sm:$0xff]   ;;  %v4013_v40 = vld [vmem:[%s4330_s20 + $0x318] sm:$0xff]  }
 0x865   : > { %3665 = vmatprep.subr.bf16.mxu0 %v3959_v26  ;;  %3687 = vmatprep.subr.bf16.mxu1 %v3960_v27  ;;  %v1784_v43 = vpack.c.bf16 %v1768_v38, %v1768_v38  ;;  %v3996_v26 = vld [vmem:[%s4330_s20 + $0x2f8] sm:$0xff]   ;;  %v4009_v38 = vld [vmem:[%s4330_s20 + $0x310] sm:$0xff]  }
 0x866   : > { %v1717_v27 = vadd.f32 %v4586_v15, %v1246_v20  ;;  %v1777_v30 = vmax.f32 %v1758_v3, 0.0  ;;  %v4001_v15 = vld [vmem:[%s4330_s20 + $0x300] sm:$0xff]   ;;  %v1786_v16 = vpack.c.bf16 %v1770_v46, %v1770_v46 }
 0x868   : > { %3666 = vmatpush3.bf16.msra.mxu0 %v3961_v45  ;;  %3688 = vmatpush3.bf16.msra.mxu1 %v3962_v50  ;;  %v4000_v45 = vld [vmem:[%s4330_s20 + $0x3c0] sm:$0xff]   ;;  %v1775_v50 = vmax.f32 %v1717_v27, 0.0  ;;  %v1793_v33 = vpack.c.bf16 %v1777_v30, %v1777_v30 }
 0x869   : > { %3667 = vmatprep.subr.bf16.mxu0 %v3963_v32  ;;  %3689 = vmatprep.subr.bf16.mxu1 %v3964_v51  ;;  %v4003_v32 = vld [vmem:[%s4330_s20 + $0x348] sm:$0xff]  }
 0x86a   : > { %v1791_v51 = vpack.c.bf16 %v1775_v50, %v1775_v50 }
 0x86c   : > { %3668 = vmatpush3.bf16.msra.mxu0 %v3965_v52  ;;  %3690 = vmatpush3.bf16.msra.mxu1 %v3966_v36  ;;  %v4006_v52 = vld [vmem:[%s4330_s20 + $0x388] sm:$0xff]   ;;  %v4007_v36 = vld [vmem:[%s4330_s20 + $0x350] sm:$0xff]  }
 0x86d   : > { %3697 = vmatprep.subr.bf16.mxu0 %v3967_v21  ;;  %3719 = vmatprep.subr.bf16.mxu1 %v3968_v22  ;;  %v4010_v21 = vld [vmem:[%s4330_s20 + $0x390] sm:$0xff]   ;;  %v4011_v22 = vld [vmem:[%s4330_s20 + $0x358] sm:$0xff]  }
 0x86f   : > { %2938 = vmatmul.mubr.bf16.vlgmr.msra.gmra.mrb[28].mxu0 %v1782_v42  ;;  %2978 = vmatmul.mubr.bf16.vlgmr.msra.gmra.mrb[32].mxu1 %v1784_v43  ;;  %v4015_v42 = vld [vmem:[%s4330_s20 + $0x360] sm:$0xff]  }
 0x870   : > { %3698 = vmatpush3.bf16.msra.mxu0 %v3969_v41  ;;  %3017 = vmatprep.mubr.bf16.mxu0 %v1787_v54  ;;  %v4014_v41 = vld [vmem:[%s4330_s20 + $0x398] sm:$0xff]   ;;  %v4016_v43 = vld [vmem:[%s4330_s20 + $0x3e0] sm:$0xff]  }
 0x871   : > { %3720 = vmatpush3.bf16.msra.mxu1 %v3970_v53  ;;  %3057 = vmatprep.mubr.bf16.mxu1 %v1789_v57  ;;  %v4017_v53 = vld [vmem:[%s4330_s20 + $0x320] sm:$0xff]   ;;  %v4021_v57 = vld [vmem:[%s4330_s20 + $0x328] sm:$0xff]  }
 0x872   : > { %3699 = vmatprep.subr.bf16.mxu0 %v3971_v55  ;;  %3721 = vmatprep.subr.bf16.mxu1 %v3972_v56  ;;  %v4018_v54 = vld [vmem:[%s4330_s20 + $0x3a0] sm:$0xff]   ;;  %v4019_v55 = vld [vmem:[%s4330_s20 + $0x368] sm:$0xff]  }
 0x873   : > { %v4020_v56 = vld [vmem:[%s4330_s20 + $0x3e8] sm:$0xff]  }
 0x874   : > { %3700 = vmatpush3.bf16.msra.mxu0 %v3973_v58  ;;  %v4022_v58 = vld [vmem:[%s4330_s20 + $0x3a8] sm:$0xff]  }
 0x875   : > { %3722 = vmatpush3.bf16.msra.mxu1 %v3974_v59  ;;  %3701 = vmatprep.subr.bf16.mxu0 %v3975_v60  ;;  %v4023_v59 = vld [vmem:[%s4330_s20 + $0x370] sm:$0xff]  }
 0x876   : > { %3723 = vmatprep.subr.bf16.mxu1 %v3976_v61  ;;  %v4024_v60 = vld [vmem:[%s4330_s20 + $0x3f0] sm:$0xff]  }
 0x877   : > { %v4025_v61 = vld [vmem:[%s4330_s20 + $0x330] sm:$0xff]  }
 0x878   : > { %3702 = vmatpush3.bf16.msra.mxu0 %v3977_v62  ;;  %v4026_v62 = vld [vmem:[%s4330_s20 + $0x3b0] sm:$0xff]  }
 0x879   : > { %3724 = vmatpush3.bf16.msra.mxu1 %v3978_v63  ;;  %3703 = vmatprep.subr.bf16.mxu0 %v3979_v0  ;;  %v4027_v63 = vld [vmem:[%s4330_s20 + $0x378] sm:$0xff]  }
 0x87a   : > { %3725 = vmatprep.subr.bf16.mxu1 %v3980_v1  ;;  %v4028_v0 = vld [vmem:[%s4330_s20 + $0x3f8] sm:$0xff]  }
 0x87b   : > { %v4029_v1 = vld [vmem:[%s4330_s20 + $0x338] sm:$0xff]  }
 0x87c   : > { %3704 = vmatpush3.bf16.msra.mxu0 %v3981_v2  ;;  %v1774_v2 = vmax.f32 %v4581_v13, 0.0 }
 0x87d   : > { %3726 = vmatpush3.bf16.msra.mxu1 %v3982_v5  ;;  %3705 = vmatprep.subr.bf16.mxu0 %v3983_v6  ;;  %v4030_v5 = vld [vmem:[%s4330_s20 + $0x3b8] sm:$0xff]   ;;  %v1776_v6 = vmax.f32 %v4584_v14, 0.0  ;;  %s4830_s20 = sld [smem:[#allocation9_spill]] }
 0x87e   : > { %3727 = vmatprep.subr.bf16.mxu1 %v3984_v7  ;;  %v1790_v7 = vpack.c.bf16 %v1774_v2, %v1774_v2 }
 0x880   : > { %3706 = vmatpush3.bf16.msra.mxu0 %v3985_v8  ;;  %v1792_v8 = vpack.c.bf16 %v1776_v6, %v1776_v6 }
 0x881   : > { %3728 = vmatpush3.bf16.msra.mxu1 %v3986_v9  ;;  %3707 = vmatprep.subr.bf16.mxu0 %v3987_v10 }
 0x882   : > { %3729 = vmatprep.subr.bf16.mxu1 %v3988_v11  ;;  %v3456_v11 = vld [vmem:[%s630_s18] ss:$0 sm:$0xff]  ;;  %s4831_s18 = sld [smem:[#allocation6_spill]] }
 0x883   : > { %s3588_s21 = sshll.u32 %s4830_s20, 7 }
 0x884   : > { %3708 = vmatpush3.bf16.msra.mxu0 %v3989_v12  ;;  %s4711_s22 = scalar_lea.hbm %s4834_s16, %s3588_s21 }
 0x885   : > { %3730 = vmatpush3.bf16.msra.mxu1 %v3990_v17  ;;  %3709 = vmatprep.subr.bf16.mxu0 %v3991_v18 }
 0x886   : > { %3731 = vmatprep.subr.bf16.mxu1 %v3992_v19 }
 0x888   : > { %3710 = vmatpush3.bf16.msra.mxu0 %v3993_v47 }
 0x889   : > { %3732 = vmatpush3.bf16.msra.mxu1 %v3994_v24  ;;  %3711 = vmatprep.subr.bf16.mxu0 %v3995_v25 }
 0x88a   : > { %3733 = vmatprep.subr.bf16.mxu1 %v3996_v26 }
 0x88c   : > { %3712 = vmatpush3.bf16.msra.mxu0 %v3997_v44 }
 0x88d   : > { %3734 = vmatpush3.bf16.msra.mxu1 %v3998_v4  ;;  %3741 = vmatprep.subr.bf16.mxu0 %v3999_v28 }
 0x88e   : > { %3763 = vmatprep.subr.bf16.mxu1 %v4000_v45 }
 0x88f   : > { %3018 = vmatmul.mubr.bf16.vlgmr.msra.gmra.mrb[32].mxu0 %v1786_v16 }
 0x890   : > { %3058 = vmatmul.mubr.bf16.vlgmr.msra.gmra.mrb[36].mxu1 %v1788_v31  ;;  %3742 = vmatpush3.bf16.msra.mxu0 %v4001_v15 }
 0x891   : > { %3097 = vmatprep.mubr.bf16.mxu0 %v1791_v51  ;;  %3764 = vmatpush3.bf16.msra.mxu1 %v4002_v48 }
 0x892   : > { %3137 = vmatprep.mubr.bf16.mxu1 %v1793_v33  ;;  %3743 = vmatprep.subr.bf16.mxu0 %v4003_v32 }
 0x893   : > { %3765 = vmatprep.subr.bf16.mxu1 %v4004_v49 }
 0x894   : > { %3744 = vmatpush3.bf16.msra.mxu0 %v4005_v35 }
 0x895   : > { %3766 = vmatpush3.bf16.msra.mxu1 %v4006_v52  ;;  %3745 = vmatprep.subr.bf16.mxu0 %v4007_v36 }
 0x896   : > { %3767 = vmatprep.subr.bf16.mxu1 %v4008_v37 }
 0x898   : > { %3746 = vmatpush3.bf16.msra.mxu0 %v4009_v38 }
 0x899   : > { %3768 = vmatpush3.bf16.msra.mxu1 %v4010_v21  ;;  %3747 = vmatprep.subr.bf16.mxu0 %v4011_v22 }
 0x89a   : > { %3769 = vmatprep.subr.bf16.mxu1 %v4012_v39 }
 0x89c   : > { %3748 = vmatpush3.bf16.msra.mxu0 %v4013_v40 }
 0x89d   : > { %3770 = vmatpush3.bf16.msra.mxu1 %v4014_v41  ;;  %3749 = vmatprep.subr.bf16.mxu0 %v4015_v42 }
 0x89e   : > { %3771 = vmatprep.subr.bf16.mxu1 %v4016_v43 }
 0x8a0   : > { %3750 = vmatpush3.bf16.msra.mxu0 %v4017_v53 }
 0x8a1   : > { %3772 = vmatpush3.bf16.msra.mxu1 %v4018_v54  ;;  %3751 = vmatprep.subr.bf16.mxu0 %v4019_v55 }
 0x8a2   : > { %3773 = vmatprep.subr.bf16.mxu1 %v4020_v56 }
 0x8a4   : > { %3752 = vmatpush3.bf16.msra.mxu0 %v4021_v57 }
 0x8a5   : > { %3774 = vmatpush3.bf16.msra.mxu1 %v4022_v58  ;;  %3753 = vmatprep.subr.bf16.mxu0 %v4023_v59 }
 0x8a6   : > { %3775 = vmatprep.subr.bf16.mxu1 %v4024_v60 }
 0x8a8   : > { %3754 = vmatpush3.bf16.msra.mxu0 %v4025_v61 }
 0x8a9   : > { %3776 = vmatpush3.bf16.msra.mxu1 %v4026_v62  ;;  %3755 = vmatprep.subr.bf16.mxu0 %v4027_v63 }
 0x8aa   : > { %3777 = vmatprep.subr.bf16.mxu1 %v4028_v0 }
 0x8ac   : > { %3756 = vmatpush3.bf16.msra.mxu0 %v4029_v1 }
 0x8ad   : > { %3778 = vmatpush3.bf16.msra.mxu1 %v4030_v5  ;;  %v3585_v5 = vld [vmem:[%s639_s5] ss:$0 sm:$0xff]  ;;  %s4835_s5 = sand.u32 1, %s4831_s18  }
 0x8ae   : > { %s3177_s23 = scalar_lea.sflag [#allocation3], %s4835_s5 }
 0x8af   : > { %3098 = vmatmul.mubr.bf16.vlgmr.msra.gmra.mrb[36].mxu0 %v1790_v7  ;;  %v3586_v7 = vld [vmem:[%s642_s26] ss:$0 sm:$0xff]  ;;  %s4146_s26 = smov [#allocation2]  }
 0x8b0   : > { %3138 = vmatmul.mubr.bf16.vlgmr.msra.gmra.mrb[40].mxu1 %v1792_v8  ;;  %s4047_s29 = sshll.u32 %s4146_s26, 4  ;;  %s4048_s29 = int_to_ptr.vmem [resolvable:$false] %s4047_s29 }
 0x8b1   : > { %s4049_s24 = scalar_lea.vmem %s4048_s29, 256  ;;  %p4050_p5 = scmp.lt.s32.totalorder %s4713_s17, %s4048_s29 }
 0x8b2   : > { %p4051_p6 = scmp.lt.s32.totalorder %s4049_s24, %s4043_s30 }
 0x8b4   : > { %p4052_p7 = por %p4051_p6, %p4050_p5 }
 0x8b6   : > { %p4053_p8 = pnand %p4052_p7, %p4046_p4 }
 0x922   : > { %v3625_v9 = vpop.f32.mrb[24].mxu0  ;;  %v3647_v10 = vpop.f32.mrb[28].mxu1 }
 0x923   : > { %v3626_v13 = vpop.f32.mrb[25].mxu0  ;;  %v3648_v12 = vpop.f32.mrb[29].mxu1 }
 0x924   : > { %v3627_v17 = vadd.f32 %v3626_v13, %v3625_v9  ;;  %v3649_v18 = vadd.f32 %v3648_v12, %v3647_v10  ;;  %v3628_v19 = vpop.f32.mrb[26].mxu0  ;;  %v3650_v14 = vpop.f32.mrb[30].mxu1 }
 0x925   : > { %v3629_v20 = vpop.f32.mrb[27].mxu0  ;;  %v3651_v23 = vpop.f32.mrb[31].mxu1 }
 0x926   : > { %v2860_v47 = vadd.f32 %v3627_v17, %v3456_v11 }
 0x928   : > { %v2900_v24 = vadd.f32 %v3649_v18, %v2860_v47 }
 0x942   : > { %v3669_v25 = vpop.f32.mrb[28].mxu0  ;;  %v3691_v26 = vpop.f32.mrb[32].mxu1 }
 0x943   : > { %v3670_v27 = vpop.f32.mrb[29].mxu0  ;;  %v3692_v3 = vpop.f32.mrb[33].mxu1 }
 0x944   : > { %v3671_v44 = vadd.f32 %v3670_v27, %v3669_v25  ;;  %v3693_v46 = vadd.f32 %v3692_v3, %v3691_v26  ;;  %v3672_v4 = vpop.f32.mrb[30].mxu0  ;;  %v3694_v28 = vpop.f32.mrb[34].mxu1 }
 0x945   : > { %v3673_v29 = vpop.f32.mrb[31].mxu0  ;;  %v3695_v45 = vpop.f32.mrb[35].mxu1 }
 0x946   : > { %v2940_v50 = vadd.f32 %v3671_v44, %v2900_v24 }
 0x948   : > { %v2980_v30 = vadd.f32 %v3693_v46, %v2940_v50 }
 0x962   : > { %v3713_v15 = vpop.f32.mrb[32].mxu0 }
 0x963   : > { %v3735_v16 = vpop.f32.mrb[36].mxu1  ;;  %v3714_v48 = vpop.f32.mrb[33].mxu0 }
 0x964   : > { %v3715_v31 = vadd.f32 %v3714_v48, %v3713_v15  ;;  %v3736_v32 = vpop.f32.mrb[37].mxu1  ;;  %v3716_v51 = vpop.f32.mrb[34].mxu0 }
 0x965   : > { %v3737_v49 = vadd.f32 %v3736_v32, %v3735_v16  ;;  %v3738_v33 = vpop.f32.mrb[38].mxu1  ;;  %v3717_v35 = vpop.f32.mrb[35].mxu0 }
 0x966   : > { %v3020_v52 = vadd.f32 %v3715_v31, %v2980_v30  ;;  %v3739_v36 = vpop.f32.mrb[39].mxu1 }
 0x968   : > { %v3060_v37 = vadd.f32 %v3737_v49, %v3020_v52 }
 0x982   : > { %v3757_v38 = vpop.f32.mrb[36].mxu0 }
 0x983   : > { %v3779_v21 = vpop.f32.mrb[40].mxu1  ;;  %v3758_v22 = vpop.f32.mrb[37].mxu0 }
 0x984   : > { %v3759_v39 = vadd.f32 %v3758_v22, %v3757_v38  ;;  %v3780_v40 = vpop.f32.mrb[41].mxu1  ;;  %v3760_v41 = vpop.f32.mrb[38].mxu0 }
 0x985   : > { %v3781_v42 = vadd.f32 %v3780_v40, %v3779_v21  ;;  %v3782_v43 = vpop.f32.mrb[42].mxu1  ;;  %v3761_v53 = vpop.f32.mrb[39].mxu0 }
 0x986   : > { %v3100_v54 = vadd.f32 %v3759_v39, %v3060_v37  ;;  %v3783_v55 = vpop.f32.mrb[43].mxu1 }
 0x988   : > { %v3140_v56 = vadd.f32 %v3781_v42, %v3100_v54 }
 0x98a   : > { %v3145_v57 = vadd.f32 %v3140_v56, %v4437_v34 }
 0x98c   : > { %v3148_v58 = vsel %vm676_vm2, %v3145_v57, 0.0 }
 0x98d   : > { %3149 = vadd.xlane.f32.xlu1 %v3148_v58 }
 0xa1a   : > { %v3150_v59 = vpop.xlane.xlu1 %3149 }
 0xa1b   : > { %v3151_v60 = vmul.f32 0.03125, %v3150_v59 }
 0xa1d   : > { %v3152_v61 = vsub.f32 %v3145_v57, %v3151_v60 }
 0xa1f   : > { %v3153_v62 = vmul.f32 %v3152_v61, %v3152_v61 }
 0xa21   : > { %v3154_v63 = vsel %vm676_vm2, %v3153_v62, 0.0 }
 0xa22   : > { %3155 = vadd.xlane.f32.xlu0 %v3154_v63 }
 0xaaf   : > { %v3156_v0 = vpop.xlane.xlu0 %3155 }
 0xab0   : > { %v3157_v1 = vmul.f32 0.03125, %v3156_v0 }
 0xab2   : > { %v3158_v2 = vadd.f32 1e-05, %v3157_v1 }
 0xab4   : > { %4041 = vrsqrt.f32 %v3158_v2 }
 0xabe   : > { %v4042_v34 = vpop.eup %4041 }
 0xabf   : > { %v3160_v6 = vmul.f32 %v4042_v34, %v3152_v61 }
 0xac1   : > { %v3167_v8 = vmul.f32 %v3585_v5, %v3160_v6 }
 0xac3   : > { %v3174_v9 = vadd.f32 %v3586_v7, %v3167_v8 }
 0xac5   : > { %3175 = vst.msk [vmem:[%s4352_s7] sm:$0xff] %vm676_vm2, %v3174_v9 }
 0xac6   : > { %4056 = shalt.err (!%p4053_p8)
}
 0xac7   : > { %s4057_s7 = scalar_lea.hbm %s4711_s22, 128  ;;  %s4061_s12 = scalar_lea.hbm %s4834_s16, 256 }
 0xac8   : > { %p4058_p10 = scmp.ne.s32.totalorder %s4711_s22, %s4057_s7  ;;  %p4062_p13 = scmp.lt.u32.totalorder %s4711_s22, %s4834_s16 }
 0xac9   : > { %p4063_p0 = scmp.lt.u32.totalorder %s4061_s12, %s4057_s7  ;;  %p4065_p2 = scmp.lt.u32.totalorder %s4057_s7, %s4711_s22 }
 0xaca   : > { %p4059_p11 = pnand %p4058_p10, %p4266_p3 }
 0xacb   : > { %p4064_p1 = por %p4063_p0, %p4062_p13 }
 0xacc   : > { %p4060_p12 = pneg %p4059_p11 }
 0xacd   : > { %p4066_p4 = por %p4065_p2, %p4064_p1 }
 0xacf   : > { %p4067_p5 = pnand %p4066_p4, %p4060_p12 }
 0xad1   : > { %4070 = shalt.err (!%p4067_p5)
}
 0xad2   : > { %3821 = dma.vmem_to_hbm [thread:$0]  (%p4266_p3), %s4713_s17, 128, %s4711_s22, %s3177_s23  }
 0xad3 PF: > { %s4836_s18 = sld [smem:[#allocation12_spill]]  ;;  %s4837_s27 = sld [smem:[#allocation5_spill]] }
 0xad9   : > { %p3827_p6 = scmp.ge.s32.totalorder %s4836_s18, 2  ;;  %s3202_s3 = sand.u32 1, %s4837_s27  }
 0xada   : > { %s3203_s6 = scalar_lea.sflag [#allocation3], %s3202_s3 }
 0xadb   : > { %p3824_p7 = pnand %p3827_p6, %p4276_p9 }
 0xadd   : > { %4104 = dma.done.wait (!%p3824_p7), %s3203_s6, 128  }
 0xade   : > { %4106 = vsyncadd (!%p3824_p7), %s3203_s6, 4294967168  ;;  %s26_s15 = sadd.s32 1, %s4836_s18   ;;  %s4839_s25 = sld [smem:[#allocation6_spill]] }
 0xadf   : > { %p23_p8 = scmp.ge.s32.totalorder %s26_s15, 6   ;;  %s4840_s26 = sld [smem:[#allocation7_spill]] }
 0xae0   : > { %s4841_s27 = sld [smem:[#allocation17_spill]]  ;;  %s4842_s28 = sld [smem:[#allocation10_spill]] }
 0xae1   : > { %s4843_s29 = sld [smem:[#allocation11_spill]]  ;;  %s4844_s30 = sld [smem:[#allocation13_spill]] }
 0xae2   : > { %s4845_s14 = sld [smem:[#allocation15_spill]]  ;;  %25 = sbr.rel (!%p23_p8) target bundleno = 14 (0xe), region = 147 }
 0xae9   :  { %3208 = vsyncpa [#allocation3], 1 }
 0xaea   :  { %3210 = vsyncpa [#allocation3 + $0x1], 1 }

</bundles_post_ra>
